<compile_context>
chip_gen: v6e
topology: v6e:2x2x1
jax: 0.10.0
libtpu: 0.0.40
codegen_flags: <defaults>
</compile_context>

<pallas_src>
import functools

import jax
import jax.numpy as jnp
from jax.experimental import pallas as pl
from jax.experimental.pallas import tpu as pltpu


def _cdiv(a, b):
    return -(-a // b)


def _round_up(a, b):
    return _cdiv(a, b) * b


def _pick_conv_tile(s_valid, cin, cout, halo_r,
                    budget_bytes=24 * 1024 * 1024, max_tile=4096):
    """Largest multiple-of-128 spatial tile whose conv working set fits a
    conservative (v7x-safe) VMEM budget; prefer >=2 tiles so the halo DMA and
    the y writeback can pipeline and the grid has parallelism."""
    kkc = 27 * cin

    def need(t):
        return (kkc * t * 2                    # bf16 im2col slab
                + 2 * cin * (t + halo_r) * 2   # double-buffered bf16 x window
                + 2 * cout * t * 2             # double-buffered bf16 y block
                + 2 * t * 4                    # double-buffered mask block
                + cout * kkc * 2               # bf16 weights
                + 8 * cout * 4)                # bias / psum / psumsq blocks

    tile = 128
    t = 256
    while t <= max_tile and need(t) <= budget_bytes:
        tile = t
        t += 128
    tile = min(tile, _round_up(max(s_valid, 1), 128))
    if s_valid > 128 and _cdiv(s_valid, tile) < 2:
        tile = _round_up(_cdiv(s_valid, 2), 128)
    return tile


def _pick_bn_tile(s_pad, cap=8192):
    """Largest multiple-of-128 divisor of s_pad (<= cap): the BN/ReLU kernel is
    purely memory-bound, so bigger lane-dense tiles amortize per-step cost."""
    k = s_pad // 128
    best = 1
    for d in range(1, k + 1):
        if k % d == 0 and 128 * d <= cap:
            best = d
    return 128 * best


def _conv3d_stats_kernel(x_hbm, w_ref, b_ref, mask_ref,
                         y_ref, psum_ref, psumsq_ref,
                         xbuf, col_ref, sem,
                         *, cin, tap_offsets, s_tile, win, n_s):
    """3x3x3 conv on one (batch, spatial-tile) block of the flattened padded
    volume, with fused masked per-channel BatchNorm partial statistics.

    x_hbm   : (N, Cin, L_in) bf16   whole padded input, left in HBM (pl.ANY)
    w_ref   : (Cout, 27*Cin) bf16   weights, taps packed into contraction dim
    b_ref   : (Cout, 1)      f32    conv bias
    mask_ref: (1, s_tile)    f32    1.0 on valid output positions of this tile
    y_ref   : (1, Cout, s_tile) bf16  conv output tile
    psum_ref, psumsq_ref: (1, Cout, 1) f32 per-n stats (accumulated over s)
    xbuf    : (2, Cin, win)  bf16   double-buffered halo window
    col_ref : (27*Cin, s_tile) bf16 im2col slab scratch
    sem     : DMA semaphores (2,)
    """
    n = pl.program_id(0)
    s = pl.program_id(1)
    slot = s & 1

    def issue(si, sl):
        start = pl.multiple_of(si * s_tile, 128)
        pltpu.make_async_copy(x_hbm.at[n, :, pl.ds(start, win)],
                              xbuf.at[sl], sem.at[sl]).start()

    # Prime the double buffer at the first tile of each batch element (keeps
    # every n independent -> safe when the n axis is sharded across cores).
    @pl.when(s == 0)
    def _():
        issue(s, slot)

    # Wait for the current tile's halo window.
    pltpu.make_async_copy(x_hbm.at[n, :, pl.ds(0, win)],
                          xbuf.at[slot], sem.at[slot]).wait()

    # Prefetch the next tile's window while this tile computes.
    @pl.when(s + 1 < n_s)
    def _():
        issue(s + 1, 1 - slot)

    # im2col: tap (kd,kh,kw) is a constant flat offset t on the padded grid, so
    # each row-block of the slab is a shifted bf16 window of the x buffer.
    for k, t in enumerate(tap_offsets):
        col_ref[k * cin:(k + 1) * cin, :] = xbuf[slot, :, t:t + s_tile]

    # Single (Cout, 27*Cin) x (27*Cin, s_tile) MXU matmul, f32 accumulation.
    acc = jnp.dot(w_ref[...], col_ref[...],
                  preferred_element_type=jnp.float32)
    acc = acc + b_ref[...]
    y_ref[0] = acc.astype(y_ref.dtype)

    # Fused masked BatchNorm partial statistics, accumulated directly into the
    # resident per-n output block (flushed to HBM once per batch element).
    m = mask_ref[...]                       # (1, s_tile)
    am = acc * m

    @pl.when(s == 0)
    def _():
        psum_ref[0] = jnp.zeros_like(psum_ref[0])
        psumsq_ref[0] = jnp.zeros_like(psumsq_ref[0])

    psum_ref[0] += jnp.sum(am, axis=1, keepdims=True)
    psumsq_ref[0] += jnp.sum(am * acc, axis=1, keepdims=True)


def _bn_relu_kernel(scale_ref, shift_ref, y_ref, o_ref):
    """Pure FMA + ReLU stream: out = max(y*scale + shift, 0).

    scale_ref/shift_ref: (Cout, 1) f32 precomputed per-channel affine
    y_ref : (1, Cout, s_tile2) bf16    o_ref : (1, Cout, s_tile2) f32
    """
    y = y_ref[0].astype(jnp.float32)
    o_ref[0] = jnp.maximum(y * scale_ref[...] + shift_ref[...],
                           0.0).astype(o_ref.dtype)


def luconv_forward(x_ncdhw, weight, bias, gamma, beta, eps=1e-5):
    """Forward of LUConv(in, out, act='relu', norm='bn') in training mode.

    x_ncdhw: (N, Cin, D, H, W)  weight: (Cout, Cin, 3, 3, 3)  bias: (Cout,)
    returns: (N, Cout, D, H, W) float32
    """
    N, Cin, D, H, W = x_ncdhw.shape
    Cout = weight.shape[0]
    Hp, Wp = H + 2, W + 2
    HpWp = Hp * Wp

    # Flat-spatial geometry: output (d,h,w) lives at flat index
    # p = d*HpWp + h*Wp + w of the padded grid, and tap (kd,kh,kw) reads the
    # flat input at p + (kd*HpWp + kh*Wp + kw).  Junk columns (h>=H or w>=W)
    # are masked out of the statistics and sliced off at the end.
    tap_offsets = tuple(kd * HpWp + kh * Wp + kw
                        for kd in range(3) for kh in range(3) for kw in range(3))
    t_max = tap_offsets[-1]
    halo_r = _round_up(t_max, 128)

    s_valid = D * HpWp
    s_tile = _pick_conv_tile(s_valid, Cin, Cout, halo_r)
    n_s = _cdiv(s_valid, s_tile)
    s_pad = n_s * s_tile
    win = s_tile + halo_r

    # Glue (plain JAX): zero-pad D/H/W, flatten spatial dims, cast to bf16
    # (native MXU operand dtype; halves HBM reads and the halo-window DMA).
    l_need = s_pad + halo_r
    extra_d = _cdiv(max(0, l_need - (D + 2) * HpWp), HpWp)
    l_in = (D + 2 + extra_d) * HpWp
    xp = jnp.pad(x_ncdhw, ((0, 0), (0, 0), (1, 1 + extra_d), (1, 1), (1, 1)))
    x_flat = xp.reshape(N, Cin, l_in).astype(jnp.bfloat16)

    kkc = 27 * Cin
    w2 = jnp.transpose(weight, (0, 2, 3, 4, 1)).reshape(Cout, kkc)
    w2 = w2.astype(jnp.bfloat16)
    b2 = bias.reshape(Cout, 1).astype(jnp.float32)

    # Valid-position mask on the padded flat grid (kept as a tiny per-tile
    # input rather than in-kernel iota to avoid vector int div/mod in-kernel).
    p = jnp.arange(s_pad)
    dd, rr = p // HpWp, p % HpWp
    hh, ww = rr // Wp, rr % Wp
    mask = ((dd < D) & (hh < H) & (ww < W)).astype(jnp.float32).reshape(1, s_pad)

    # ---- Conv3d + fused BN partial statistics (Pallas) ----
    y_flat, psum, psumsq = pl.pallas_call(
        functools.partial(_conv3d_stats_kernel, cin=Cin,
                          tap_offsets=tap_offsets, s_tile=s_tile,
                          win=win, n_s=n_s),
        grid=(N, n_s),
        in_specs=[
            pl.BlockSpec(memory_space=pl.ANY),                 # x stays in HBM
            pl.BlockSpec((Cout, kkc), lambda n, s: (0, 0)),
            pl.BlockSpec((Cout, 1), lambda n, s: (0, 0)),
            pl.BlockSpec((1, s_tile), lambda n, s: (0, s)),
        ],
        out_shape=(
            jax.ShapeDtypeStruct((N, Cout, s_pad), jnp.bfloat16),
            jax.ShapeDtypeStruct((N, Cout, 1), jnp.float32),
            jax.ShapeDtypeStruct((N, Cout, 1), jnp.float32),
        ),
        out_specs=(
            pl.BlockSpec((1, Cout, s_tile), lambda n, s: (n, 0, s)),
            pl.BlockSpec((1, Cout, 1), lambda n, s: (n, 0, 0)),
            pl.BlockSpec((1, Cout, 1), lambda n, s: (n, 0, 0)),
        ),
        scratch_shapes=[
            pltpu.VMEM((2, Cin, win), jnp.bfloat16),   # double-buffered halo
            pltpu.VMEM((kkc, s_tile), jnp.bfloat16),   # im2col slab
            pltpu.SemaphoreType.DMA((2,)),
        ],
        compiler_params=pltpu.CompilerParams(
            dimension_semantics=("parallel", "arbitrary"),
            vmem_limit_bytes=48 * 1024 * 1024),
    )(x_flat, w2, b2, mask)

    # Tiny plain-JAX epilogue: fold the N-reduction / divide / rsqrt into
    # per-channel scale & shift ONCE, so the second kernel is pure FMA+ReLU.
    count = float(N * D * H * W)
    s1 = jnp.sum(psum, axis=0)                    # (Cout, 1)
    s2 = jnp.sum(psumsq, axis=0)                  # (Cout, 1)
    mean = s1 / count
    var = s2 / count - mean * mean                # biased batch variance
    inv = jax.lax.rsqrt(var + eps)
    scale = gamma.reshape(Cout, 1) * inv
    shift = beta.reshape(Cout, 1) - mean * scale

    # ---- scale*y + shift, ReLU (Pallas), large lane-dense tiles ----
    s_tile2 = _pick_bn_tile(s_pad)
    n_s2 = s_pad // s_tile2
    out_flat = pl.pallas_call(
        _bn_relu_kernel,
        grid=(N, n_s2),
        in_specs=[
            pl.BlockSpec((Cout, 1), lambda n, s: (0, 0)),
            pl.BlockSpec((Cout, 1), lambda n, s: (0, 0)),
            pl.BlockSpec((1, Cout, s_tile2), lambda n, s: (n, 0, s)),
        ],
        out_shape=jax.ShapeDtypeStruct((N, Cout, s_pad), jnp.float32),
        out_specs=pl.BlockSpec((1, Cout, s_tile2), lambda n, s: (n, 0, s)),
        compiler_params=pltpu.CompilerParams(
            dimension_semantics=("parallel", "parallel"),
            vmem_limit_bytes=48 * 1024 * 1024),
    )(scale, shift, y_flat)

    # Glue: drop the halo columns -> (N, Cout, D, H, W).  Channels-first end to
    # end, no transposes anywhere.
    # TODO(synk): fold this strip into the BN kernel (per-(n,d) grid) if the
    # extra HBM pass ever matters more than the resulting masked W<128 stores.
    out = out_flat[:, :, :D * HpWp].reshape(N, Cout, D, Hp, Wp)[:, :, :, :H, :W]
    return out


def _reference(x, weight, bias, gamma, beta, eps=1e-5):
    """Pure-JAX f32 reference (mirrors PyTorch training-mode LUConv)."""
    Cout = weight.shape[0]
    y = jax.lax.conv_general_dilated(
        x, weight, window_strides=(1, 1, 1),
        padding=((1, 1), (1, 1), (1, 1)),
        dimension_numbers=("NCDHW", "OIDHW", "NCDHW"))
    y = y + bias.reshape(1, Cout, 1, 1, 1)
    mean = jnp.mean(y, axis=(0, 2, 3, 4), keepdims=True)
    var = jnp.mean((y - mean) ** 2, axis=(0, 2, 3, 4), keepdims=True)
    yn = (y - mean) * jax.lax.rsqrt(var + eps)
    out = yn * gamma.reshape(1, Cout, 1, 1, 1) + beta.reshape(1, Cout, 1, 1, 1)
    return jnp.maximum(out, 0.0)


if __name__ == "__main__":
    N, Cin, Cout = 2, 4, 8
    D = H = W = 8

    key = jax.random.PRNGKey(0)
    k_w, k_b, k_x = jax.random.split(key, 3)

    # Deterministic PyTorch-like kaiming-uniform init for the conv.
    fan_in = Cin * 3 * 3 * 3
    bound = 1.0 / (fan_in ** 0.5)
    weight = jax.random.uniform(k_w, (Cout, Cin, 3, 3, 3), jnp.float32,
                                -bound, bound)
    bias = jax.random.uniform(k_b, (Cout,), jnp.float32, -bound, bound)
    gamma = jnp.ones((Cout,), jnp.float32)     # BatchNorm3d affine defaults
    beta = jnp.zeros((Cout,), jnp.float32)

    x = jax.random.normal(k_x, (N, Cin, D, H, W), jnp.float32)

    out = luconv_forward(x, weight, bias, gamma, beta)
    out = jax.block_until_ready(out)

    ref = _reference(x, weight, bias, gamma, beta)
    assert out.shape == (N, Cout, D, H, W)
    # bf16 MXU operands + bf16 intermediate y (f32 accumulation / stats):
    # tolerance relaxed accordingly vs the pure-f32 reference.
    assert jnp.allclose(out, ref, atol=5e-2, rtol=5e-2), "mismatch vs reference"

    print("KERNEL_OK")
</pallas_src>

<mosaic_0001>
module attributes {stable_mosaic.version = 11 : i64} {
  func.func @_conv3d_stats_kernel(%arg0: i32, %arg1: i32, %arg2: memref<2x4x1300xbf16, #tpu.memory_space<any>>, %arg3: memref<8x108xbf16, #tpu.memory_space<vmem>>, %arg4: memref<8x1xf32, #tpu.memory_space<vmem>>, %arg5: memref<1x512xf32, #tpu.memory_space<vmem>>, %arg6: memref<1x8x512xbf16, #tpu.memory_space<vmem>>, %arg7: memref<1x8x1xf32, #tpu.memory_space<vmem>>, %arg8: memref<1x8x1xf32, #tpu.memory_space<vmem>>, %arg9: memref<2x4x768xbf16, #tpu.memory_space<vmem>>, %arg10: memref<108x512xbf16, #tpu.memory_space<vmem>>, %arg11: memref<2x!tpu.dma_semaphore, #tpu.memory_space<semaphore_mem>>) attributes {dimension_semantics = [#tpu.dimension_semantics<parallel>, #tpu.dimension_semantics<arbitrary>], iteration_bounds = array<i64: 2, 2>, scalar_prefetch = 0 : i64, scratch_operands = 3 : i64, tpu.core_type = #tpu.core_type<tc>, window_params = [{}, {pipeline_mode = #tpu.pipeline_mode<synchronous>, transform_indices = @transform_1, window_bounds = array<i64: 8, 108>}, {pipeline_mode = #tpu.pipeline_mode<synchronous>, transform_indices = @transform_2, window_bounds = array<i64: 8, 1>}, {transform_indices = @transform_3, window_bounds = array<i64: 1, 512>}, {transform_indices = @transform_4, window_bounds = array<i64: 1, 8, 512>}, {transform_indices = @transform_5, window_bounds = array<i64: 1, 8, 1>}, {transform_indices = @transform_6, window_bounds = array<i64: 1, 8, 1>}]} {
    %c1_i32 = arith.constant 1 : i32
    %0 = arith.andi %arg1, %c1_i32 : i32
    %c0_i32 = arith.constant 0 : i32
    %1 = arith.cmpi eq, %arg1, %c0_i32 : i32
    %2 = arith.extui %1 : i1 to i32
    %c0_i32_0 = arith.constant 0 : i32
    %3 = arith.cmpi ne, %2, %c0_i32_0 : i32
    scf.if %3 {
      %c512_i32 = arith.constant 512 : i32
      %155 = arith.muli %arg1, %c512_i32 : i32
      %156 = tpu.assume_multiple %155, 128 : i32
      %c0_i32_92 = arith.constant 0 : i32
      %157 = tpu.memref_slice %arg2[%arg0, %c0_i32_92, %156] : memref<2x4x1300xbf16, #tpu.memory_space<any>> -> memref<1x4x768xbf16, #tpu.memory_space<any>>
      %158 = tpu.memref_squeeze %157 : memref<1x4x768xbf16, #tpu.memory_space<any>> -> memref<4x768xbf16, #tpu.memory_space<any>>
      %c0_i32_93 = arith.constant 0 : i32
      %c0_i32_94 = arith.constant 0 : i32
      %159 = tpu.memref_slice %arg9[%0, %c0_i32_93, %c0_i32_94] : memref<2x4x768xbf16, #tpu.memory_space<vmem>> -> memref<1x4x768xbf16, #tpu.memory_space<vmem>>
      %160 = tpu.memref_squeeze %159 : memref<1x4x768xbf16, #tpu.memory_space<vmem>> -> memref<4x768xbf16, #tpu.memory_space<vmem>>
      %161 = tpu.memref_slice %arg11[%0] : memref<2x!tpu.dma_semaphore, #tpu.memory_space<semaphore_mem>> -> memref<1x!tpu.dma_semaphore, #tpu.memory_space<semaphore_mem>>
      %162 = tpu.memref_squeeze %161 : memref<1x!tpu.dma_semaphore, #tpu.memory_space<semaphore_mem>> -> memref<!tpu.dma_semaphore, #tpu.memory_space<semaphore_mem>>
      tpu.enqueue_dma source(%158 : memref<4x768xbf16, #tpu.memory_space<any>>) target(%160 : memref<4x768xbf16, #tpu.memory_space<vmem>>) target_semaphore(%162 : memref<!tpu.dma_semaphore, #tpu.memory_space<semaphore_mem>>)
    } else {
    }
    %c0_i32_1 = arith.constant 0 : i32
    %c0_i32_2 = arith.constant 0 : i32
    %4 = tpu.memref_slice %arg2[%arg0, %c0_i32_1, %c0_i32_2] : memref<2x4x1300xbf16, #tpu.memory_space<any>> -> memref<1x4x768xbf16, #tpu.memory_space<any>>
    %5 = tpu.memref_squeeze %4 : memref<1x4x768xbf16, #tpu.memory_space<any>> -> memref<4x768xbf16, #tpu.memory_space<any>>
    %c0_i32_3 = arith.constant 0 : i32
    %c0_i32_4 = arith.constant 0 : i32
    %6 = tpu.memref_slice %arg9[%0, %c0_i32_3, %c0_i32_4] : memref<2x4x768xbf16, #tpu.memory_space<vmem>> -> memref<1x4x768xbf16, #tpu.memory_space<vmem>>
    %7 = tpu.memref_squeeze %6 : memref<1x4x768xbf16, #tpu.memory_space<vmem>> -> memref<4x768xbf16, #tpu.memory_space<vmem>>
    %8 = tpu.memref_slice %arg11[%0] : memref<2x!tpu.dma_semaphore, #tpu.memory_space<semaphore_mem>> -> memref<1x!tpu.dma_semaphore, #tpu.memory_space<semaphore_mem>>
    %9 = tpu.memref_squeeze %8 : memref<1x!tpu.dma_semaphore, #tpu.memory_space<semaphore_mem>> -> memref<!tpu.dma_semaphore, #tpu.memory_space<semaphore_mem>>
    tpu.wait_dma2 semaphore(%9 : memref<!tpu.dma_semaphore, #tpu.memory_space<semaphore_mem>>) src(%5 : memref<4x768xbf16, #tpu.memory_space<any>>) dst(%7 : memref<4x768xbf16, #tpu.memory_space<vmem>>)
    %c1_i32_5 = arith.constant 1 : i32
    %10 = arith.addi %arg1, %c1_i32_5 : i32
    %c2_i32 = arith.constant 2 : i32
    %11 = arith.cmpi slt, %10, %c2_i32 : i32
    %12 = arith.extui %11 : i1 to i32
    %c0_i32_6 = arith.constant 0 : i32
    %13 = arith.cmpi ne, %12, %c0_i32_6 : i32
    scf.if %13 {
      %c1_i32_92 = arith.constant 1 : i32
      %155 = arith.addi %arg1, %c1_i32_92 : i32
      %c1_i32_93 = arith.constant 1 : i32
      %156 = arith.subi %c1_i32_93, %0 : i32
      %c512_i32 = arith.constant 512 : i32
      %157 = arith.muli %155, %c512_i32 : i32
      %158 = tpu.assume_multiple %157, 128 : i32
      %c0_i32_94 = arith.constant 0 : i32
      %159 = tpu.memref_slice %arg2[%arg0, %c0_i32_94, %158] : memref<2x4x1300xbf16, #tpu.memory_space<any>> -> memref<1x4x768xbf16, #tpu.memory_space<any>>
      %160 = tpu.memref_squeeze %159 : memref<1x4x768xbf16, #tpu.memory_space<any>> -> memref<4x768xbf16, #tpu.memory_space<any>>
      %c0_i32_95 = arith.constant 0 : i32
      %c0_i32_96 = arith.constant 0 : i32
      %161 = tpu.memref_slice %arg9[%156, %c0_i32_95, %c0_i32_96] : memref<2x4x768xbf16, #tpu.memory_space<vmem>> -> memref<1x4x768xbf16, #tpu.memory_space<vmem>>
      %162 = tpu.memref_squeeze %161 : memref<1x4x768xbf16, #tpu.memory_space<vmem>> -> memref<4x768xbf16, #tpu.memory_space<vmem>>
      %163 = tpu.memref_slice %arg11[%156] : memref<2x!tpu.dma_semaphore, #tpu.memory_space<semaphore_mem>> -> memref<1x!tpu.dma_semaphore, #tpu.memory_space<semaphore_mem>>
      %164 = tpu.memref_squeeze %163 : memref<1x!tpu.dma_semaphore, #tpu.memory_space<semaphore_mem>> -> memref<!tpu.dma_semaphore, #tpu.memory_space<semaphore_mem>>
      tpu.enqueue_dma source(%160 : memref<4x768xbf16, #tpu.memory_space<any>>) target(%162 : memref<4x768xbf16, #tpu.memory_space<vmem>>) target_semaphore(%164 : memref<!tpu.dma_semaphore, #tpu.memory_space<semaphore_mem>>)
    } else {
    }
    %14 = arith.index_cast %0 : i32 to index
    %c0 = arith.constant 0 : index
    %c0_7 = arith.constant 0 : index
    %15 = vector.load %arg9[%14, %c0, %c0_7] : memref<2x4x768xbf16, #tpu.memory_space<vmem>>, vector<1x4x512xbf16>
    %16 = vector.shape_cast %15 : vector<1x4x512xbf16> to vector<4x512xbf16>
    %c0_8 = arith.constant 0 : index
    %c0_9 = arith.constant 0 : index
    %17 = vector.load %arg10[%c0_8, %c0_9] : memref<108x512xbf16, #tpu.memory_space<vmem>>, vector<4x512xbf16>
    tpu.vector_store %arg10[%c0_8, %c0_9], %16 {strides = array<i32>} : memref<108x512xbf16, #tpu.memory_space<vmem>>, vector<4x512xbf16>,
    %18 = arith.index_cast %0 : i32 to index
    %c0_10 = arith.constant 0 : index
    %c1 = arith.constant 1 : index
    %19 = vector.load %arg9[%18, %c0_10, %c1] : memref<2x4x768xbf16, #tpu.memory_space<vmem>>, vector<1x4x512xbf16>
    %20 = vector.shape_cast %19 : vector<1x4x512xbf16> to vector<4x512xbf16>
    %c4 = arith.constant 4 : index
    %c0_11 = arith.constant 0 : index
    %21 = vector.load %arg10[%c4, %c0_11] : memref<108x512xbf16, #tpu.memory_space<vmem>>, vector<4x512xbf16>
    tpu.vector_store %arg10[%c4, %c0_11], %20 {strides = array<i32>} : memref<108x512xbf16, #tpu.memory_space<vmem>>, vector<4x512xbf16>,
    %22 = arith.index_cast %0 : i32 to index
    %c0_12 = arith.constant 0 : index
    %c2 = arith.constant 2 : index
    %23 = vector.load %arg9[%22, %c0_12, %c2] : memref<2x4x768xbf16, #tpu.memory_space<vmem>>, vector<1x4x512xbf16>
    %24 = vector.shape_cast %23 : vector<1x4x512xbf16> to vector<4x512xbf16>
    %c8 = arith.constant 8 : index
    %c0_13 = arith.constant 0 : index
    %25 = vector.load %arg10[%c8, %c0_13] : memref<108x512xbf16, #tpu.memory_space<vmem>>, vector<4x512xbf16>
    tpu.vector_store %arg10[%c8, %c0_13], %24 {strides = array<i32>} : memref<108x512xbf16, #tpu.memory_space<vmem>>, vector<4x512xbf16>,
    %26 = arith.index_cast %0 : i32 to index
    %c0_14 = arith.constant 0 : index
    %c10 = arith.constant 10 : index
    %27 = vector.load %arg9[%26, %c0_14, %c10] : memref<2x4x768xbf16, #tpu.memory_space<vmem>>, vector<1x4x512xbf16>
    %28 = vector.shape_cast %27 : vector<1x4x512xbf16> to vector<4x512xbf16>
    %c12 = arith.constant 12 : index
    %c0_15 = arith.constant 0 : index
    %29 = vector.load %arg10[%c12, %c0_15] : memref<108x512xbf16, #tpu.memory_space<vmem>>, vector<4x512xbf16>
    tpu.vector_store %arg10[%c12, %c0_15], %28 {strides = array<i32>} : memref<108x512xbf16, #tpu.memory_space<vmem>>, vector<4x512xbf16>,
    %30 = arith.index_cast %0 : i32 to index
    %c0_16 = arith.constant 0 : index
    %c11 = arith.constant 11 : index
    %31 = vector.load %arg9[%30, %c0_16, %c11] : memref<2x4x768xbf16, #tpu.memory_space<vmem>>, vector<1x4x512xbf16>
    %32 = vector.shape_cast %31 : vector<1x4x512xbf16> to vector<4x512xbf16>
    %c16 = arith.constant 16 : index
    %c0_17 = arith.constant 0 : index
    %33 = vector.load %arg10[%c16, %c0_17] : memref<108x512xbf16, #tpu.memory_space<vmem>>, vector<4x512xbf16>
    tpu.vector_store %arg10[%c16, %c0_17], %32 {strides = array<i32>} : memref<108x512xbf16, #tpu.memory_space<vmem>>, vector<4x512xbf16>,
    %34 = arith.index_cast %0 : i32 to index
    %c0_18 = arith.constant 0 : index
    %c12_19 = arith.constant 12 : index
    %35 = vector.load %arg9[%34, %c0_18, %c12_19] : memref<2x4x768xbf16, #tpu.memory_space<vmem>>, vector<1x4x512xbf16>
    %36 = vector.shape_cast %35 : vector<1x4x512xbf16> to vector<4x512xbf16>
    %c20 = arith.constant 20 : index
    %c0_20 = arith.constant 0 : index
    %37 = vector.load %arg10[%c20, %c0_20] : memref<108x512xbf16, #tpu.memory_space<vmem>>, vector<4x512xbf16>
    tpu.vector_store %arg10[%c20, %c0_20], %36 {strides = array<i32>} : memref<108x512xbf16, #tpu.memory_space<vmem>>, vector<4x512xbf16>,
    %38 = arith.index_cast %0 : i32 to index
    %c0_21 = arith.constant 0 : index
    %c20_22 = arith.constant 20 : index
    %39 = vector.load %arg9[%38, %c0_21, %c20_22] : memref<2x4x768xbf16, #tpu.memory_space<vmem>>, vector<1x4x512xbf16>
    %40 = vector.shape_cast %39 : vector<1x4x512xbf16> to vector<4x512xbf16>
    %c24 = arith.constant 24 : index
    %c0_23 = arith.constant 0 : index
    %41 = vector.load %arg10[%c24, %c0_23] : memref<108x512xbf16, #tpu.memory_space<vmem>>, vector<4x512xbf16>
    tpu.vector_store %arg10[%c24, %c0_23], %40 {strides = array<i32>} : memref<108x512xbf16, #tpu.memory_space<vmem>>, vector<4x512xbf16>,
    %42 = arith.index_cast %0 : i32 to index
    %c0_24 = arith.constant 0 : index
    %c21 = arith.constant 21 : index
    %43 = vector.load %arg9[%42, %c0_24, %c21] : memref<2x4x768xbf16, #tpu.memory_space<vmem>>, vector<1x4x512xbf16>
    %44 = vector.shape_cast %43 : vector<1x4x512xbf16> to vector<4x512xbf16>
    %c28 = arith.constant 28 : index
    %c0_25 = arith.constant 0 : index
    %45 = vector.load %arg10[%c28, %c0_25] : memref<108x512xbf16, #tpu.memory_space<vmem>>, vector<4x512xbf16>
    tpu.vector_store %arg10[%c28, %c0_25], %44 {strides = array<i32>} : memref<108x512xbf16, #tpu.memory_space<vmem>>, vector<4x512xbf16>,
    %46 = arith.index_cast %0 : i32 to index
    %c0_26 = arith.constant 0 : index
    %c22 = arith.constant 22 : index
    %47 = vector.load %arg9[%46, %c0_26, %c22] : memref<2x4x768xbf16, #tpu.memory_space<vmem>>, vector<1x4x512xbf16>
    %48 = vector.shape_cast %47 : vector<1x4x512xbf16> to vector<4x512xbf16>
    %c32 = arith.constant 32 : index
    %c0_27 = arith.constant 0 : index
    %49 = vector.load %arg10[%c32, %c0_27] : memref<108x512xbf16, #tpu.memory_space<vmem>>, vector<4x512xbf16>
    tpu.vector_store %arg10[%c32, %c0_27], %48 {strides = array<i32>} : memref<108x512xbf16, #tpu.memory_space<vmem>>, vector<4x512xbf16>,
    %50 = arith.index_cast %0 : i32 to index
    %c0_28 = arith.constant 0 : index
    %c100 = arith.constant 100 : index
    %51 = vector.load %arg9[%50, %c0_28, %c100] : memref<2x4x768xbf16, #tpu.memory_space<vmem>>, vector<1x4x512xbf16>
    %52 = vector.shape_cast %51 : vector<1x4x512xbf16> to vector<4x512xbf16>
    %c36 = arith.constant 36 : index
    %c0_29 = arith.constant 0 : index
    %53 = vector.load %arg10[%c36, %c0_29] : memref<108x512xbf16, #tpu.memory_space<vmem>>, vector<4x512xbf16>
    tpu.vector_store %arg10[%c36, %c0_29], %52 {strides = array<i32>} : memref<108x512xbf16, #tpu.memory_space<vmem>>, vector<4x512xbf16>,
    %54 = arith.index_cast %0 : i32 to index
    %c0_30 = arith.constant 0 : index
    %c101 = arith.constant 101 : index
    %55 = vector.load %arg9[%54, %c0_30, %c101] : memref<2x4x768xbf16, #tpu.memory_space<vmem>>, vector<1x4x512xbf16>
    %56 = vector.shape_cast %55 : vector<1x4x512xbf16> to vector<4x512xbf16>
    %c40 = arith.constant 40 : index
    %c0_31 = arith.constant 0 : index
    %57 = vector.load %arg10[%c40, %c0_31] : memref<108x512xbf16, #tpu.memory_space<vmem>>, vector<4x512xbf16>
    tpu.vector_store %arg10[%c40, %c0_31], %56 {strides = array<i32>} : memref<108x512xbf16, #tpu.memory_space<vmem>>, vector<4x512xbf16>,
    %58 = arith.index_cast %0 : i32 to index
    %c0_32 = arith.constant 0 : index
    %c102 = arith.constant 102 : index
    %59 = vector.load %arg9[%58, %c0_32, %c102] : memref<2x4x768xbf16, #tpu.memory_space<vmem>>, vector<1x4x512xbf16>
    %60 = vector.shape_cast %59 : vector<1x4x512xbf16> to vector<4x512xbf16>
    %c44 = arith.constant 44 : index
    %c0_33 = arith.constant 0 : index
    %61 = vector.load %arg10[%c44, %c0_33] : memref<108x512xbf16, #tpu.memory_space<vmem>>, vector<4x512xbf16>
    tpu.vector_store %arg10[%c44, %c0_33], %60 {strides = array<i32>} : memref<108x512xbf16, #tpu.memory_space<vmem>>, vector<4x512xbf16>,
    %62 = arith.index_cast %0 : i32 to index
    %c0_34 = arith.constant 0 : index
    %c110 = arith.constant 110 : index
    %63 = vector.load %arg9[%62, %c0_34, %c110] : memref<2x4x768xbf16, #tpu.memory_space<vmem>>, vector<1x4x512xbf16>
    %64 = vector.shape_cast %63 : vector<1x4x512xbf16> to vector<4x512xbf16>
    %c48 = arith.constant 48 : index
    %c0_35 = arith.constant 0 : index
    %65 = vector.load %arg10[%c48, %c0_35] : memref<108x512xbf16, #tpu.memory_space<vmem>>, vector<4x512xbf16>
    tpu.vector_store %arg10[%c48, %c0_35], %64 {strides = array<i32>} : memref<108x512xbf16, #tpu.memory_space<vmem>>, vector<4x512xbf16>,
    %66 = arith.index_cast %0 : i32 to index
    %c0_36 = arith.constant 0 : index
    %c111 = arith.constant 111 : index
    %67 = vector.load %arg9[%66, %c0_36, %c111] : memref<2x4x768xbf16, #tpu.memory_space<vmem>>, vector<1x4x512xbf16>
    %68 = vector.shape_cast %67 : vector<1x4x512xbf16> to vector<4x512xbf16>
    %c52 = arith.constant 52 : index
    %c0_37 = arith.constant 0 : index
    %69 = vector.load %arg10[%c52, %c0_37] : memref<108x512xbf16, #tpu.memory_space<vmem>>, vector<4x512xbf16>
    tpu.vector_store %arg10[%c52, %c0_37], %68 {strides = array<i32>} : memref<108x512xbf16, #tpu.memory_space<vmem>>, vector<4x512xbf16>,
    %70 = arith.index_cast %0 : i32 to index
    %c0_38 = arith.constant 0 : index
    %c112 = arith.constant 112 : index
    %71 = vector.load %arg9[%70, %c0_38, %c112] : memref<2x4x768xbf16, #tpu.memory_space<vmem>>, vector<1x4x512xbf16>
    %72 = vector.shape_cast %71 : vector<1x4x512xbf16> to vector<4x512xbf16>
    %c56 = arith.constant 56 : index
    %c0_39 = arith.constant 0 : index
    %73 = vector.load %arg10[%c56, %c0_39] : memref<108x512xbf16, #tpu.memory_space<vmem>>, vector<4x512xbf16>
    tpu.vector_store %arg10[%c56, %c0_39], %72 {strides = array<i32>} : memref<108x512xbf16, #tpu.memory_space<vmem>>, vector<4x512xbf16>,
    %74 = arith.index_cast %0 : i32 to index
    %c0_40 = arith.constant 0 : index
    %c120 = arith.constant 120 : index
    %75 = vector.load %arg9[%74, %c0_40, %c120] : memref<2x4x768xbf16, #tpu.memory_space<vmem>>, vector<1x4x512xbf16>
    %76 = vector.shape_cast %75 : vector<1x4x512xbf16> to vector<4x512xbf16>
    %c60 = arith.constant 60 : index
    %c0_41 = arith.constant 0 : index
    %77 = vector.load %arg10[%c60, %c0_41] : memref<108x512xbf16, #tpu.memory_space<vmem>>, vector<4x512xbf16>
    tpu.vector_store %arg10[%c60, %c0_41], %76 {strides = array<i32>} : memref<108x512xbf16, #tpu.memory_space<vmem>>, vector<4x512xbf16>,
    %78 = arith.index_cast %0 : i32 to index
    %c0_42 = arith.constant 0 : index
    %c121 = arith.constant 121 : index
    %79 = vector.load %arg9[%78, %c0_42, %c121] : memref<2x4x768xbf16, #tpu.memory_space<vmem>>, vector<1x4x512xbf16>
    %80 = vector.shape_cast %79 : vector<1x4x512xbf16> to vector<4x512xbf16>
    %c64 = arith.constant 64 : index
    %c0_43 = arith.constant 0 : index
    %81 = vector.load %arg10[%c64, %c0_43] : memref<108x512xbf16, #tpu.memory_space<vmem>>, vector<4x512xbf16>
    tpu.vector_store %arg10[%c64, %c0_43], %80 {strides = array<i32>} : memref<108x512xbf16, #tpu.memory_space<vmem>>, vector<4x512xbf16>,
    %82 = arith.index_cast %0 : i32 to index
    %c0_44 = arith.constant 0 : index
    %c122 = arith.constant 122 : index
    %83 = vector.load %arg9[%82, %c0_44, %c122] : memref<2x4x768xbf16, #tpu.memory_space<vmem>>, vector<1x4x512xbf16>
    %84 = vector.shape_cast %83 : vector<1x4x512xbf16> to vector<4x512xbf16>
    %c68 = arith.constant 68 : index
    %c0_45 = arith.constant 0 : index
    %85 = vector.load %arg10[%c68, %c0_45] : memref<108x512xbf16, #tpu.memory_space<vmem>>, vector<4x512xbf16>
    tpu.vector_store %arg10[%c68, %c0_45], %84 {strides = array<i32>} : memref<108x512xbf16, #tpu.memory_space<vmem>>, vector<4x512xbf16>,
    %86 = arith.index_cast %0 : i32 to index
    %c0_46 = arith.constant 0 : index
    %c200 = arith.constant 200 : index
    %87 = vector.load %arg9[%86, %c0_46, %c200] : memref<2x4x768xbf16, #tpu.memory_space<vmem>>, vector<1x4x512xbf16>
    %88 = vector.shape_cast %87 : vector<1x4x512xbf16> to vector<4x512xbf16>
    %c72 = arith.constant 72 : index
    %c0_47 = arith.constant 0 : index
    %89 = vector.load %arg10[%c72, %c0_47] : memref<108x512xbf16, #tpu.memory_space<vmem>>, vector<4x512xbf16>
    tpu.vector_store %arg10[%c72, %c0_47], %88 {strides = array<i32>} : memref<108x512xbf16, #tpu.memory_space<vmem>>, vector<4x512xbf16>,
    %90 = arith.index_cast %0 : i32 to index
    %c0_48 = arith.constant 0 : index
    %c201 = arith.constant 201 : index
    %91 = vector.load %arg9[%90, %c0_48, %c201] : memref<2x4x768xbf16, #tpu.memory_space<vmem>>, vector<1x4x512xbf16>
    %92 = vector.shape_cast %91 : vector<1x4x512xbf16> to vector<4x512xbf16>
    %c76 = arith.constant 76 : index
    %c0_49 = arith.constant 0 : index
    %93 = vector.load %arg10[%c76, %c0_49] : memref<108x512xbf16, #tpu.memory_space<vmem>>, vector<4x512xbf16>
    tpu.vector_store %arg10[%c76, %c0_49], %92 {strides = array<i32>} : memref<108x512xbf16, #tpu.memory_space<vmem>>, vector<4x512xbf16>,
    %94 = arith.index_cast %0 : i32 to index
    %c0_50 = arith.constant 0 : index
    %c202 = arith.constant 202 : index
    %95 = vector.load %arg9[%94, %c0_50, %c202] : memref<2x4x768xbf16, #tpu.memory_space<vmem>>, vector<1x4x512xbf16>
    %96 = vector.shape_cast %95 : vector<1x4x512xbf16> to vector<4x512xbf16>
    %c80 = arith.constant 80 : index
    %c0_51 = arith.constant 0 : index
    %97 = vector.load %arg10[%c80, %c0_51] : memref<108x512xbf16, #tpu.memory_space<vmem>>, vector<4x512xbf16>
    tpu.vector_store %arg10[%c80, %c0_51], %96 {strides = array<i32>} : memref<108x512xbf16, #tpu.memory_space<vmem>>, vector<4x512xbf16>,
    %98 = arith.index_cast %0 : i32 to index
    %c0_52 = arith.constant 0 : index
    %c210 = arith.constant 210 : index
    %99 = vector.load %arg9[%98, %c0_52, %c210] : memref<2x4x768xbf16, #tpu.memory_space<vmem>>, vector<1x4x512xbf16>
    %100 = vector.shape_cast %99 : vector<1x4x512xbf16> to vector<4x512xbf16>
    %c84 = arith.constant 84 : index
    %c0_53 = arith.constant 0 : index
    %101 = vector.load %arg10[%c84, %c0_53] : memref<108x512xbf16, #tpu.memory_space<vmem>>, vector<4x512xbf16>
    tpu.vector_store %arg10[%c84, %c0_53], %100 {strides = array<i32>} : memref<108x512xbf16, #tpu.memory_space<vmem>>, vector<4x512xbf16>,
    %102 = arith.index_cast %0 : i32 to index
    %c0_54 = arith.constant 0 : index
    %c211 = arith.constant 211 : index
    %103 = vector.load %arg9[%102, %c0_54, %c211] : memref<2x4x768xbf16, #tpu.memory_space<vmem>>, vector<1x4x512xbf16>
    %104 = vector.shape_cast %103 : vector<1x4x512xbf16> to vector<4x512xbf16>
    %c88 = arith.constant 88 : index
    %c0_55 = arith.constant 0 : index
    %105 = vector.load %arg10[%c88, %c0_55] : memref<108x512xbf16, #tpu.memory_space<vmem>>, vector<4x512xbf16>
    tpu.vector_store %arg10[%c88, %c0_55], %104 {strides = array<i32>} : memref<108x512xbf16, #tpu.memory_space<vmem>>, vector<4x512xbf16>,
    %106 = arith.index_cast %0 : i32 to index
    %c0_56 = arith.constant 0 : index
    %c212 = arith.constant 212 : index
    %107 = vector.load %arg9[%106, %c0_56, %c212] : memref<2x4x768xbf16, #tpu.memory_space<vmem>>, vector<1x4x512xbf16>
    %108 = vector.shape_cast %107 : vector<1x4x512xbf16> to vector<4x512xbf16>
    %c92 = arith.constant 92 : index
    %c0_57 = arith.constant 0 : index
    %109 = vector.load %arg10[%c92, %c0_57] : memref<108x512xbf16, #tpu.memory_space<vmem>>, vector<4x512xbf16>
    tpu.vector_store %arg10[%c92, %c0_57], %108 {strides = array<i32>} : memref<108x512xbf16, #tpu.memory_space<vmem>>, vector<4x512xbf16>,
    %110 = arith.index_cast %0 : i32 to index
    %c0_58 = arith.constant 0 : index
    %c220 = arith.constant 220 : index
    %111 = vector.load %arg9[%110, %c0_58, %c220] : memref<2x4x768xbf16, #tpu.memory_space<vmem>>, vector<1x4x512xbf16>
    %112 = vector.shape_cast %111 : vector<1x4x512xbf16> to vector<4x512xbf16>
    %c96 = arith.constant 96 : index
    %c0_59 = arith.constant 0 : index
    %113 = vector.load %arg10[%c96, %c0_59] : memref<108x512xbf16, #tpu.memory_space<vmem>>, vector<4x512xbf16>
    tpu.vector_store %arg10[%c96, %c0_59], %112 {strides = array<i32>} : memref<108x512xbf16, #tpu.memory_space<vmem>>, vector<4x512xbf16>,
    %114 = arith.index_cast %0 : i32 to index
    %c0_60 = arith.constant 0 : index
    %c221 = arith.constant 221 : index
    %115 = vector.load %arg9[%114, %c0_60, %c221] : memref<2x4x768xbf16, #tpu.memory_space<vmem>>, vector<1x4x512xbf16>
    %116 = vector.shape_cast %115 : vector<1x4x512xbf16> to vector<4x512xbf16>
    %c100_61 = arith.constant 100 : index
    %c0_62 = arith.constant 0 : index
    %117 = vector.load %arg10[%c100_61, %c0_62] : memref<108x512xbf16, #tpu.memory_space<vmem>>, vector<4x512xbf16>
    tpu.vector_store %arg10[%c100_61, %c0_62], %116 {strides = array<i32>} : memref<108x512xbf16, #tpu.memory_space<vmem>>, vector<4x512xbf16>,
    %118 = arith.index_cast %0 : i32 to index
    %c0_63 = arith.constant 0 : index
    %c222 = arith.constant 222 : index
    %119 = vector.load %arg9[%118, %c0_63, %c222] : memref<2x4x768xbf16, #tpu.memory_space<vmem>>, vector<1x4x512xbf16>
    %120 = vector.shape_cast %119 : vector<1x4x512xbf16> to vector<4x512xbf16>
    %c104 = arith.constant 104 : index
    %c0_64 = arith.constant 0 : index
    %121 = vector.load %arg10[%c104, %c0_64] : memref<108x512xbf16, #tpu.memory_space<vmem>>, vector<4x512xbf16>
    tpu.vector_store %arg10[%c104, %c0_64], %120 {strides = array<i32>} : memref<108x512xbf16, #tpu.memory_space<vmem>>, vector<4x512xbf16>,
    %c0_65 = arith.constant 0 : index
    %c0_66 = arith.constant 0 : index
    %122 = vector.load %arg3[%c0_65, %c0_66] : memref<8x108xbf16, #tpu.memory_space<vmem>>, vector<8x108xbf16>
    %c0_67 = arith.constant 0 : index
    %c0_68 = arith.constant 0 : index
    %123 = vector.load %arg10[%c0_67, %c0_68] : memref<108x512xbf16, #tpu.memory_space<vmem>>, vector<108x512xbf16>
    %cst = arith.constant dense<0.000000e+00> : vector<8x512xf32>
    %124 = tpu.matmul %122, %123, %cst {dimension_numbers = #tpu.dot_dimension_numbers<[1], [0], [0], [1], [0, 0, 1, 1], [], []>} : vector<8x108xbf16>, vector<108x512xbf16>, vector<8x512xf32> -> vector<8x512xf32>
    %c0_69 = arith.constant 0 : index
    %c0_70 = arith.constant 0 : index
    %125 = vector.load %arg4[%c0_69, %c0_70] : memref<8x1xf32, #tpu.memory_space<vmem>>, vector<8x1xf32>
    %126 = vector.broadcast %125 : vector<8x1xf32> to vector<8x512xf32>
    %127 = arith.addf %124, %126 : vector<8x512xf32>
    %128 = arith.truncf %127 : vector<8x512xf32> to vector<8x512xbf16>
    %c0_71 = arith.constant 0 : index
    %c0_72 = arith.constant 0 : index
    %c0_73 = arith.constant 0 : index
    %129 = vector.load %arg6[%c0_71, %c0_72, %c0_73] : memref<1x8x512xbf16, #tpu.memory_space<vmem>>, vector<1x8x512xbf16>
    %130 = vector.shape_cast %129 : vector<1x8x512xbf16> to vector<8x512xbf16>
    %131 = vector.shape_cast %128 : vector<8x512xbf16> to vector<1x8x512xbf16>
    tpu.vector_store %arg6[%c0_71, %c0_72, %c0_73], %131 {strides = array<i32>} : memref<1x8x512xbf16, #tpu.memory_space<vmem>>, vector<1x8x512xbf16>,
    %c0_74 = arith.constant 0 : index
    %c0_75 = arith.constant 0 : index
    %132 = vector.load %arg5[%c0_74, %c0_75] : memref<1x512xf32, #tpu.memory_space<vmem>>, vector<1x512xf32>
    %133 = vector.broadcast %132 : vector<1x512xf32> to vector<8x512xf32>
    %134 = arith.mulf %127, %133 : vector<8x512xf32>
    %c0_i32_76 = arith.constant 0 : i32
    %135 = arith.cmpi eq, %arg1, %c0_i32_76 : i32
    %136 = arith.extui %135 : i1 to i32
    %c0_i32_77 = arith.constant 0 : i32
    %137 = arith.cmpi ne, %136, %c0_i32_77 : i32
    scf.if %137 {
      %cst_92 = arith.constant 0.000000e+00 : f32
      %155 = vector.broadcast %cst_92 : f32 to vector<8x1xf32>
      %c0_93 = arith.constant 0 : index
      %c0_94 = arith.constant 0 : index
      %c0_95 = arith.constant 0 : index
      %156 = vector.load %arg7[%c0_93, %c0_94, %c0_95] : memref<1x8x1xf32, #tpu.memory_space<vmem>>, vector<1x8x1xf32>
      %157 = vector.shape_cast %156 : vector<1x8x1xf32> to vector<8x1xf32>
      %158 = vector.shape_cast %155 : vector<8x1xf32> to vector<1x8x1xf32>
      tpu.vector_store %arg7[%c0_93, %c0_94, %c0_95], %158 {strides = array<i32>} : memref<1x8x1xf32, #tpu.memory_space<vmem>>, vector<1x8x1xf32>,
      %cst_96 = arith.constant 0.000000e+00 : f32
      %159 = vector.broadcast %cst_96 : f32 to vector<8x1xf32>
      %c0_97 = arith.constant 0 : index
      %c0_98 = arith.constant 0 : index
      %c0_99 = arith.constant 0 : index
      %160 = vector.load %arg8[%c0_97, %c0_98, %c0_99] : memref<1x8x1xf32, #tpu.memory_space<vmem>>, vector<1x8x1xf32>
      %161 = vector.shape_cast %160 : vector<1x8x1xf32> to vector<8x1xf32>
      %162 = vector.shape_cast %159 : vector<8x1xf32> to vector<1x8x1xf32>
      tpu.vector_store %arg8[%c0_97, %c0_98, %c0_99], %162 {strides = array<i32>} : memref<1x8x1xf32, #tpu.memory_space<vmem>>, vector<1x8x1xf32>,
    } else {
    }
    %c0_78 = arith.constant 0 : index
    %c0_79 = arith.constant 0 : index
    %c0_80 = arith.constant 0 : index
    %138 = vector.load %arg7[%c0_78, %c0_79, %c0_80] : memref<1x8x1xf32, #tpu.memory_space<vmem>>, vector<1x8x1xf32>
    %139 = vector.shape_cast %138 : vector<1x8x1xf32> to vector<8x1xf32>
    %cst_81 = arith.constant dense<0.000000e+00> : vector<8xf32>
    %140 = vector.multi_reduction <add>, %134, %cst_81 [1] : vector<8x512xf32> to vector<8xf32>
    %141 = vector.shape_cast %140 : vector<8xf32> to vector<8x1xf32>
    %142 = arith.addf %139, %141 : vector<8x1xf32>
    %c0_82 = arith.constant 0 : index
    %c0_83 = arith.constant 0 : index
    %c0_84 = arith.constant 0 : index
    %143 = vector.load %arg7[%c0_82, %c0_83, %c0_84] : memref<1x8x1xf32, #tpu.memory_space<vmem>>, vector<1x8x1xf32>
    %144 = vector.shape_cast %143 : vector<1x8x1xf32> to vector<8x1xf32>
    %145 = vector.shape_cast %142 : vector<8x1xf32> to vector<1x8x1xf32>
    tpu.vector_store %arg7[%c0_82, %c0_83, %c0_84], %145 {strides = array<i32>} : memref<1x8x1xf32, #tpu.memory_space<vmem>>, vector<1x8x1xf32>,
    %c0_85 = arith.constant 0 : index
    %c0_86 = arith.constant 0 : index
    %c0_87 = arith.constant 0 : index
    %146 = vector.load %arg8[%c0_85, %c0_86, %c0_87] : memref<1x8x1xf32, #tpu.memory_space<vmem>>, vector<1x8x1xf32>
    %147 = vector.shape_cast %146 : vector<1x8x1xf32> to vector<8x1xf32>
    %148 = arith.mulf %134, %127 : vector<8x512xf32>
    %cst_88 = arith.constant dense<0.000000e+00> : vector<8xf32>
    %149 = vector.multi_reduction <add>, %148, %cst_88 [1] : vector<8x512xf32> to vector<8xf32>
    %150 = vector.shape_cast %149 : vector<8xf32> to vector<8x1xf32>
    %151 = arith.addf %147, %150 : vector<8x1xf32>
    %c0_89 = arith.constant 0 : index
    %c0_90 = arith.constant 0 : index
    %c0_91 = arith.constant 0 : index
    %152 = vector.load %arg8[%c0_89, %c0_90, %c0_91] : memref<1x8x1xf32, #tpu.memory_space<vmem>>, vector<1x8x1xf32>
    %153 = vector.shape_cast %152 : vector<1x8x1xf32> to vector<8x1xf32>
    %154 = vector.shape_cast %151 : vector<8x1xf32> to vector<1x8x1xf32>
    tpu.vector_store %arg8[%c0_89, %c0_90, %c0_91], %154 {strides = array<i32>} : memref<1x8x1xf32, #tpu.memory_space<vmem>>, vector<1x8x1xf32>,
    return
  }
  func.func @transform_1(%arg0: i32, %arg1: i32) -> (i32, i32) {
    %c0_i32 = arith.constant 0 : i32
    %c0_i32_0 = arith.constant 0 : i32
    %c0_i32_1 = arith.constant 0 : i32
    return %c0_i32, %c0_i32_0 : i32, i32
  }
  func.func @transform_2(%arg0: i32, %arg1: i32) -> (i32, i32) {
    %c0_i32 = arith.constant 0 : i32
    %c0_i32_0 = arith.constant 0 : i32
    %c0_i32_1 = arith.constant 0 : i32
    return %c0_i32, %c0_i32_0 : i32, i32
  }
  func.func @transform_3(%arg0: i32, %arg1: i32) -> (i32, i32) {
    %c0_i32 = arith.constant 0 : i32
    %c0_i32_0 = arith.constant 0 : i32
    return %c0_i32, %arg1 : i32, i32
  }
  func.func @transform_4(%arg0: i32, %arg1: i32) -> (i32, i32, i32) {
    %c0_i32 = arith.constant 0 : i32
    %c0_i32_0 = arith.constant 0 : i32
    return %arg0, %c0_i32, %arg1 : i32, i32, i32
  }
  func.func @transform_5(%arg0: i32, %arg1: i32) -> (i32, i32, i32) {
    %c0_i32 = arith.constant 0 : i32
    %c0_i32_0 = arith.constant 0 : i32
    %c0_i32_1 = arith.constant 0 : i32
    return %arg0, %c0_i32, %c0_i32_0 : i32, i32, i32
  }
  func.func @transform_6(%arg0: i32, %arg1: i32) -> (i32, i32, i32) {
    %c0_i32 = arith.constant 0 : i32
    %c0_i32_0 = arith.constant 0 : i32
    %c0_i32_1 = arith.constant 0 : i32
    return %arg0, %c0_i32, %c0_i32_0 : i32, i32, i32
  }
}

</mosaic_0001>

<bundles_post_ra>
// kernel: tpu_custom_call.1
= control target key start
LH: loop header
LB: loop body
LE: loop exit
PB: predicated region body
PF: predicated region fallthrough
CT: control target
= control target key end

     0   :  { %s2903_s0 = inlined_call_operand.hbm [shape: bf16[2,4,1300], index: 0, kind: input, shape index: {}]   ;;  %s2904_s1 = inlined_call_operand.vmem [shape: bf16[8,108], index: 1, kind: input, shape index: {}]   ;;  %s2905_s2 = inlined_call_operand.vmem [shape: f32[8,1], index: 2, kind: input, shape index: {}]   ;;  %s2906_s3 = inlined_call_operand.vmem [shape: f32[1,1024], index: 3, kind: input, shape index: {}]   ;;  %s2907_s4 = inlined_call_operand.hbm [shape: bf16[2,8,1024], index: 4, kind: output, shape index: {0}]   ;;  %s2908_s5 = inlined_call_operand.vmem [shape: f32[2,8,1], index: 5, kind: output, shape index: {1}]   ;;  %s2909_s6 = inlined_call_operand.vmem [shape: f32[2,8,1], index: 6, kind: output, shape index: {2}]  }
   0x1   :  { %2927 = sst [smem:[#allocation25_spill]] %s2907_s4 }
   0x2   :  { %2928 = sst [smem:[#allocation26_spill]] %s2908_s5 }
   0x3   :  { %2929 = sst [smem:[#allocation27_spill]] %s2909_s6 }
   0x4   :  { %12 = vsyncpa [#allocation6], 0 }
   0x5   :  { %14 = vsyncpa [#allocation6 + $0x1], 0  ;;  %s2484_s21 = smov 0   ;;  %s2486_s22 = smov 0  }
   0x6   :  { %s2488_s23 = smov 0   ;;  %s2490_s24 = smov 0  }
   0x7   :  { %s2492_s25 = smov 0   ;;  %s2494_s26 = smov 0  }
   0x8   :  { %s2496_s27 = smov 0   ;;  %s2498_s28 = smov 0  }
   0x9 LB: > { %2930 = sst [smem:[#allocation15_spill]] %s2388_s21  ;;  %s2022_s29 = sadd.s32 4294967295, %s2416_s28   ;;  %s2416_s28 = sphi %s2498_s28, %s20_s28   ;;  %s2412_s27 = sphi %s2496_s27, %s2963_s27   ;;  %s2408_s26 = sphi %s2494_s26, %s2962_s26   ;;  %s2404_s25 = sphi %s2492_s25, %s2961_s25   ;;  %s2400_s24 = sphi %s2490_s24, %s2960_s24   ;;  %s2396_s23 = sphi %s2488_s23, %s2959_s23   ;;  %s2392_s22 = sphi %s2486_s22, %s2965_s22   ;;  %s2388_s21 = sphi %s2484_s21, %s2964_s21  }
   0xa   : > { %2931 = sst [smem:[#allocation16_spill]] %s2396_s23  ;;  %s2023_s30 = sadd.s32 4294967294, %s2416_s28  }
   0xb   : > { %2932 = sst [smem:[#allocation17_spill]] %s2408_s26  ;;  %s29_s7 = sadd.s32 1, %s2408_s26 }
   0xc   : > { %2933 = sst [smem:[#allocation18_spill]] %s2412_s27  ;;  %p30_p0 = scmp.ge.s32.totalorder %s29_s7, 2 }
   0xd   : > { %2934 = sst [smem:[#allocation19_spill]] %s2416_s28  ;;  %s32_s8 = sadd.s32 1, %s2412_s27 }
   0xe   : > { %p119_p1 = scmp.ne.s32.totalorder %s2396_s23, %s2392_s22  ;;  %p120_p2 = scmp.eq.s32.totalorder %s2022_s29, 3 }
   0xf   : > { %s2967_s7 = smov (%p30_p0, %s29_s7), 0  ;;  %s2969_s8 = smov (!%p30_p0, %s32_s8), %s2412_s27 }
  0x10   : > { %2935 = sst [smem:[#allocation20_spill]] %s2967_s7  ;;  %s105_s9 = ssub.s32 %s2408_s26, %s2967_s7 }
  0x11   : > { %p2535_p3 = por %p120_p2, %p119_p1  ;;  %p34_p4 = scmp.ge.s32.totalorder %s2969_s8, 2 }
  0x12   : > { %p125_p5 = scmp.ne.s32.totalorder %s2392_s22, %s2388_s21  ;;  %p126_p6 = scmp.eq.s32.totalorder %s2023_s30, 3 }
  0x13   : > { %s2936_s10 = scalar_select %p2535_p3, 1, 0 }
  0x14   : > { %p2026_p7 = scmp.ge.s32.totalorder %s2416_s28, 1  ;;  %s2971_s8 = smov (%p34_p4, %s2969_s8), 0 }
  0x15   : > { %2937 = sst [smem:[#allocation21_spill]] %s2936_s10  ;;  %p2544_p8 = por %p126_p6, %p125_p5 }
  0x16   : > { %2938 = sst [smem:[#allocation22_spill]] %s2971_s8  ;;  %p210_p9 = scmp.lt.s32.totalorder %s2416_s28, 5 }
  0x17   : > { %s2939_s11 = scalar_select %p2544_p8, 1, 0 }
  0x18   : > { %s104_s12 = ssub.s32 %s2412_s27, %s2971_s8  ;;  %s109_s13 = sadd.s32 1, %s2396_s23 }
  0x19   : > { %2940 = sst [smem:[#allocation23_spill]] %s2939_s11  ;;  %s106_s14 = sor.u32 %s105_s9, %s104_s12 }
  0x1a   : > { %p211_p10 = pnand %p2026_p7, %p210_p9  ;;  %p107_p11 = scmp.eq.s32.totalorder %s106_s14, 0 }
  0x1b   : > { %s2910_s16 = sand.u32 (!%p211_p10), 1, %s2392_s22   ;;  %s2557_s17 = sshll.u32 (!%p211_p10), %s2400_s24, 2 }
  0x1c   : > { %s2553_s15 = scalar_select %p107_p11, %s2396_s23, %s109_s13  }
  0x1d   : > { %214 = sbr.rel (%p211_p10) target bundleno = 732 (0x2dc), region = 32  ;;  %s2561_s18 = sshll.u32 (!%p211_p10), %s2910_s16, 4 }
  0x1e   : > { %2941 = sst [smem:[#allocation24_spill]] %s2553_s15  ;;  %p246_p12 = scmp.lt.s32.totalorder (!%p211_p10), %s2557_s17, 7 }
  0x1f   : > { %p251_p13 = scmp.lt.s32.totalorder (!%p211_p10), %s2404_s25, 1  ;;  %s2574_s12 = sand.u32 (!%p211_p10), 1, %s2400_s24 }
  0x20   : > { %s2942_s5 = sld [smem:[#allocation26_spill]] (!%p211_p10)  ;;  %s2919_s15 = sshll.u32 (!%p211_p10), %s2400_s24, 9 }
  0x21   : > { %s2943_s6 = sld [smem:[#allocation27_spill]] (!%p211_p10)  ;;  %s266_s29 = sshra.s32 (!%p211_p10), %s2919_s15, 7 }
  0x22   : > { %s2566_s19 = scalar_select %p246_p12, %s2557_s17, 7 }
  0x23   : > { %s252_s20 = scalar_select %p251_p13, %s2404_s25, 1 }
  0x24   : > { %s2918_s30 = smul.u32 11, %s2404_s25  ;;  %p2115_p1 = scmp.eq.s32.totalorder %s2400_s24, 0 }
  0x25   : > { %s2029_s13 = sshll.u32 %s252_s20, 3  ;;  %s2098_s9 = smul.u32 12, %s2574_s12 }
  0x26   : > { %s2580_s8 = scalar_lea.vmem %s2942_s5, %s2029_s13  ;;  %s269_s20 = sadd.s32 %s2918_s30, %s266_s29 }
  0x27   : > { %s2585_s26 = scalar_lea.vmem %s2943_s6, %s2029_s13  ;;  %s2033_s23 = sshll.u32 %s269_s20, 5 }
  0x28   : > { %s2598_s16 = scalar_lea.hbm %s2903_s0, %s2033_s23  ;;  %s2600_s27 = scalar_lea.vmem [#allocation2], %s2098_s9 }
  0x29   : > { %s283_s7 = sshll.u32 %s2600_s27, 4  ;;  %s275_s13 = scalar_lea.sflag [#allocation4], %s2574_s12  ;;  %s284_s7 = int_to_ptr.vmem [resolvable:$true] %s283_s7 }
  0x2a   : > { %s2270_s14 = scalar_lea.hbm %s2598_s16, 192  ;;  %s2921_s21 = scalar_lea.hbm %s2903_s0, 704 }
  0x2b   : > { %p2271_p2 = scmp.ne.s32.totalorder %s2598_s16, %s2270_s14  ;;  %p2275_p6 = scmp.lt.s32.totalorder %s2598_s16, %s2903_s0 }
  0x2c   : > { %p2276_p7 = scmp.lt.s32.totalorder %s2921_s21, %s2270_s14 }
  0x2d   : > { %p2272_p4 = pnand %p2271_p2, %p2115_p1 }
  0x2e   : > { %p2277_p9 = por %p2276_p7, %p2275_p6 }
  0x2f   : > { %p2273_p5 = pneg %p2272_p4 }
  0x31   : > { %p2278_p10 = pnand %p2277_p9, %p2273_p5 }
  0x33   : > { %2281 = shalt.err (!%p2278_p10)  }
  0x34   : > { %s2282_s15 = scalar_lea.vmem %s284_s7, 192  ;;  %s2418_s29 = smov [#allocation2]  }
  0x35   : > { %p2283_p11 = scmp.ne.s32.totalorder %s284_s7, %s2282_s15  ;;  %s2286_s20 = sshll.u32 %s2418_s29, 4  ;;  %s2621_s20 = int_to_ptr.vmem [resolvable:$false] %s2286_s20 }
  0x36   : > { %s2920_s23 = scalar_lea.vmem %s2621_s20, 384  ;;  %p2289_p2 = scmp.lt.s32.totalorder %s284_s7, %s2621_s20 }
  0x37   : > { %p2284_p12 = pnand %p2283_p11, %p2115_p1  ;;  %p2290_p4 = scmp.lt.s32.totalorder %s2920_s23, %s2282_s15 }
  0x39   : > { %p2285_p13 = pneg %p2284_p12  ;;  %p2291_p6 = por %p2290_p4, %p2289_p2 }
  0x3b   : > { %p2292_p5 = pnand %p2291_p6, %p2285_p13 }
  0x3d   : > { %2295 = shalt.err (!%p2292_p5)  }
  0x3e   : > { %2106 = dma.hbm_to_vmem [thread:$0]  (%p2115_p1), %s2598_s16, 192, %s284_s7, %s275_s13 }
  0x3f   : > { %s2631_s30 = scalar_lea.vmem [#allocation5], %s2561_s18 }
  0x40   : > { %2380 = dma.done.wait %s275_s13, 192 }
  0x41   : > { %2381 = vsyncadd %s275_s13, 4294967104  ;;  %s295_s14 = sadd.s32 1, %s2400_s24  ;;  %s300_s11 = ssub.s32 1, %s2574_s12  ;;  %v2419_v0 = vmov 1983009808   ;;  %v352_v2 = vlaneseq }
  0x42   : > { %p2635_p7 = scmp.lt.s32.totalorder %s295_s14, 2  ;;  %s2945_s9 = sshll.u32 %s2400_s24, 9  ;;  %v350_v1 = vunpack.c.l.s4 %v2419_v0 }
  0x43   : > { %s2101_s29 = sadd.s32 512, %s2945_s9  ;;  %s2102_s23 = smul.u32 12, %s300_s11 }
  0x44   : > { %s302_s21 = sshra.s32 %s2101_s29, 7  ;;  %s2946_s18 = smul.u32 11, %s2404_s25 }
  0x45   : > { %s310_s13 = scalar_lea.vmem [#allocation2], %s2102_s23  ;;  %s311_s14 = scalar_lea.sflag [#allocation4], %s300_s11 }
  0x46   : > { %s305_s16 = sadd.s32 %s302_s21, %s2946_s18  ;;  %s319_s5 = sshll.u32 %s310_s13, 4  ;;  %s320_s5 = int_to_ptr.vmem [resolvable:$true] %s319_s5 }
  0x47   : > { %s2038_s7 = sshll.u32 %s305_s16, 5  ;;  %s2947_s23 = scalar_lea.hbm %s2903_s0, 704 }
  0x48   : > { %s307_s12 = scalar_lea.hbm %s2903_s0, %s2038_s7 }
  0x49   : > { %s2296_s4 = scalar_lea.hbm %s307_s12, 192  ;;  %p2301_p11 = scmp.lt.s32.totalorder %s307_s12, %s2903_s0 }
  0x4a   : > { %p2297_p1 = scmp.ne.s32.totalorder %s307_s12, %s2296_s4  ;;  %p2302_p12 = scmp.lt.s32.totalorder %s2947_s23, %s2296_s4 }
  0x4c   : > { %p2298_p9 = pnand %p2297_p1, %p2635_p7  ;;  %p2303_p13 = por %p2302_p12, %p2301_p11 }
  0x4e   : > { %p2299_p10 = pneg %p2298_p9 }
  0x50   : > { %p2304_p2 = pnand %p2303_p13, %p2299_p10 }
  0x52   : > { %2307 = shalt.err (!%p2304_p2)  }
  0x53   : > { %s2308_s6 = scalar_lea.vmem %s320_s5, 192  ;;  %p2315_p1 = scmp.lt.s32.totalorder %s320_s5, %s2621_s20 }
  0x54   : > { %p2309_p4 = scmp.ne.s32.totalorder %s320_s5, %s2308_s6  ;;  %s2948_s28 = scalar_lea.vmem %s2621_s20, 384 }
  0x55   : > { %p2316_p9 = scmp.lt.s32.totalorder %s2948_s28, %s2308_s6 }
  0x56   : > { %p2310_p6 = pnand %p2309_p4, %p2635_p7 }
  0x57   : > { %p2317_p0 = por %p2316_p9, %p2315_p1 }
  0x58   : > { %p2311_p5 = pneg %p2310_p6 }
  0x5a   : > { %p2318_p8 = pnand %p2317_p0, %p2311_p5 }
  0x5c   : > { %2321 = shalt.err (!%p2318_p8)  }
  0x5d   : > { %2108 = dma.hbm_to_vmem [thread:$0]  (%p2635_p7), %s307_s12, 192, %s320_s5, %s311_s14  ;;  %v351_v3 = vunpack.c.0.s8 %v350_v1  ;;  %v2662_v4 = vshrl.u32 %v352_v2, 7  ;;  %vm380_vm0 = vcmask 1043456   ;;  %vm1450_vm1 = vcmask 285696  }
  0x5e   : > { %v2054_v6 = vld.sshfl [vmem:[%s2600_s27 + $0xa] sm:$0x3 pattern:$0x76325410]  ;;  %v1369_v7 = vld [vmem:[%s2600_s27 + $0x2] sm:$0xff]  ;;  %s2420_s4 = smov 34  }
  0x5f   : > { %v2665_v5 = vsub.s32 %v351_v3, %v2662_v4  ;;  %1488 = vrot.lane.b32.xlu0 %v2054_v6, %s2420_s4  ;;  %s2421_s10 = smov 36   ;;  %v1417_v9 = vcombine.low %v1369_v7, %v1369_v7  ;;  %s2422_s20 = smov 54   ;;  %v2213_v11 = vld [vmem:[%s2600_s27 + $0xa] ss:$0 sps:$4 sm:$0x33]   ;;  %v1373_v13 = vcombine.high %v1369_v7, %v1369_v7  ;;  %v1013_v18 = vld [vmem:[%s2600_s27] sm:$0xff] }
  0x60   : > { %1399 = vrot.lane.b32.xlu1 %v2054_v6, %s2421_s10  ;;  %s2423_s5 = smov 35   ;;  %v2215_v15 = vld [vmem:[%s2600_s27 + $0xa] ss:$0 sps:$4 sm:$0x33]   ;;  %s2424_s11 = smov 46   ;;  %v1017_v21 = vcombine.high %v1013_v18, %v1013_v18  ;;  %v1061_v23 = vcombine.low %v1013_v18, %v1013_v18  ;;  %vm1405_vm2 = vcmask 293888  }
  0x61   : > { %v1380_v8 = vrot.slane %v1369_v7, %v2665_v5  ;;  %v1424_v10 = vrot.slane %v1417_v9, %v2665_v5  ;;  %v1439_v12 = vrot.slane %v2213_v11, %v2665_v5  ;;  %v1387_v14 = vrot.slane %v1373_v13, %v2665_v5  ;;  %s2425_s15 = smov 45   ;;  %v2216_v17 = vld [vmem:[%s2600_s27 + $0xa] ss:$0 sps:$4 sm:$0x33]   ;;  %s2426_s18 = smov 44   ;;  %v323_v0 = vld [vmem:[%s2600_s27] sm:$0xff] }
  0x62   : > { %v1261_v16 = vrot.slane %v2215_v15, %v2665_v5  ;;  %v1350_v19 = vrot.slane %v2216_v17, %v2665_v5  ;;  %v2680_v20 = vrot.slane %v1013_v18, %v2665_v5  ;;  %s2427_s16 = smov 7   ;;  %v2684_v22 = vrot.slane %v1017_v21, %v2665_v5  ;;  %v2687_v24 = vld.sshfl [vmem:[%s2600_s27 + $0x8] sm:$0x3 pattern:$0x76325410]  ;;  %s2428_s7 = smov 6  }
  0x63   : > { %1395 = vrot.lane.b32.xlu0 %v1380_v8, %s2421_s10  ;;  %v2692_v25 = vrot.slane %v1061_v23, %v2665_v5  ;;  %v2219_v26 = vld [vmem:[%s2600_s27 + $0x8] ss:$0 sps:$4 sm:$0x33]   ;;  %s2429_s13 = smov 56   ;;  %s2430_s12 = smov 55   ;;  %vm1494_vm3 = vcmask 277504   ;;  %v325_v3 = vcombine.high %v323_v0, %v323_v0 }
  0x64   : > { %1217 = vrot.lane.b32.xlu1 %v1380_v8, %s2422_s20  ;;  %v1083_v27 = vrot.slane %v2219_v26, %v2665_v5  ;;  %v2220_v28 = vld [vmem:[%s2600_s27 + $0xa] ss:$0 sps:$4 sm:$0x33]   ;;  %s2431_s14 = smov 18   ;;  %s2432_s9 = smov 17   ;;  %vm1227_vm4 = vcmask 441344  }
  0x65   : > { %v1172_v29 = vrot.slane %v2220_v28, %v2665_v5  ;;  %v2221_v30 = vld [vmem:[%s2600_s27 + $0x8] ss:$0 sps:$4 sm:$0x33]   ;;  %s2433_s29 = smov 16   ;;  %s2434_s21 = smov 8   ;;  %vm1272_vm5 = vcmask 375808  }
  0x66   : > { %v905_v31 = vrot.slane %v2221_v30, %v2665_v5  ;;  %v2222_v32 = vld [vmem:[%s2600_s27 + $0x8] ss:$0 sps:$4 sm:$0x33]   ;;  %s2435_s23 = smov 106   ;;  %s2436_s6 = smov 28   ;;  %vm1677_vm6 = vcmask 1045504  }
  0x67   : > { %1442 = vrot.lane.b32.xlu0 %v1380_v8, %s2423_s5  ;;  %v994_v33 = vrot.slane %v2222_v32, %v2665_v5  ;;  %v2223_v34 = vld [vmem:[%s2600_s27 + $0x8] ss:$0 sps:$4 sm:$0x33]   ;;  %s2437_s28 = smov 27   ;;  %vm1316_vm7 = vcmask 367616   ;;  %vm1361_vm8 = vcmask 359424  }
  0x68   : > { %1440 = vrot.lane.b32.xlu1 %v1424_v10, %s2423_s5  ;;  %v727_v35 = vrot.slane %v2223_v34, %v2665_v5  ;;  %v2224_v36 = vld [vmem:[%s2600_s27 + $0x8] ss:$0 sps:$4 sm:$0x33]   ;;  %vm1049_vm9 = vcmask 56320   ;;  %vm1094_vm10 = vcmask 48128   ;;  %vm1138_vm11 = vcmask 457728  }
  0x69   : > { %v816_v37 = vrot.slane %v2224_v36, %v2665_v5  ;;  %v2225_v40 = vld [vmem:[%s2600_s27 + $0x8] ss:$0 sps:$4 sm:$0x33]   ;;  %vm1183_vm12 = vcmask 449536   ;;  %vm871_vm13 = vcmask 146432   ;;  %vm916_vm14 = vcmask 138240  }
  0x6a   : > { %v549_v43 = vrot.slane %v2225_v40, %v2665_v5  ;;  %v2226_v53 = vld [vmem:[%s2600_s27 + $0x8] ss:$0 sps:$4 sm:$0x33]   ;;  %vm960_vm15 = vcmask 130048   ;;  %p2950_p8 = scmp.ne.s32.totalorder %s2400_s24, 0 }
  0x6b   : > { %1484 = vrot.lane.b32.xlu0 %v1380_v8, %s2420_s4  ;;  %v638_v1 = vrot.slane %v2226_v53, %v2665_v5  ;;  %v2227_v2 = vld [vmem:[%s2600_s27 + $0x8] ss:$0 sps:$4 sm:$0x33]  }
  0x6c   : > { %1444 = vrot.lane.b32.xlu1 %v1439_v12, %s2423_s5  ;;  %s2441_s5 = smov 108   ;;  %2040 = vst.sshfl [vmem:[#allocation3] sm:$0xf pattern:$0x76325410] %v323_v0 }
  0x6d   : > { %2041 = vst.sshfl [vmem:[#allocation3 + $0x8] sm:$0xf pattern:$0x76325410] %v325_v3 }
  0x6f   : > { %1397 = vrot.lane.b32.xlu0 %v1387_v14, %s2421_s10  ;;  %s2439_s10 = smov 117  }
  0x70   : > { %1486 = vrot.lane.b32.xlu1 %v1387_v14, %s2420_s4  ;;  %s2438_s4 = smov 26  }
  0x73   : > { %1219 = vrot.lane.b32.xlu0 %v1387_v14, %s2422_s20 }
  0x74   : > { %1221 = vrot.lane.b32.xlu1 %v2054_v6, %s2422_s20  ;;  %s2440_s20 = smov 116  }
  0x77   : > { %1262 = vrot.lane.b32.xlu0 %v1424_v10, %s2424_s11 }
  0x78   : > { %1264 = vrot.lane.b32.xlu1 %v1380_v8, %s2424_s11 }
  0x7b   : > { %1266 = vrot.lane.b32.xlu0 %v1261_v16, %s2424_s11  ;;  %s2442_s11 = smov 107  }
  0x7c   : > { %1306 = vrot.lane.b32.xlu1 %v1380_v8, %s2425_s15 }
  0x7f   : > { %1308 = vrot.lane.b32.xlu0 %v1387_v14, %s2425_s15 }
  0x80   : > { %1310 = vrot.lane.b32.xlu1 %v2054_v6, %s2425_s15  ;;  %s2443_s15 = smov 127  }
  0x83   : > { %1351 = vrot.lane.b32.xlu0 %v1424_v10, %s2426_s18 }
  0x84   : > { %1353 = vrot.lane.b32.xlu1 %v1380_v8, %s2426_s18 }
  0x87   : > { %1355 = vrot.lane.b32.xlu0 %v1350_v19, %s2426_s18  ;;  %v370_v19 = vrot.slane %v2227_v2, %v2665_v5  ;;  %s2444_s18 = smov 126  }
  0x88   : > { %1039 = vrot.lane.b32.xlu1 %v2680_v20, %s2427_s16 }
  0x8b   : > { %1041 = vrot.lane.b32.xlu0 %v2684_v22, %s2427_s16 }
  0x8c   : > { %1043 = vrot.lane.b32.xlu1 %v2687_v24, %s2427_s16 }
  0x8f   : > { %1084 = vrot.lane.b32.xlu0 %v2692_v25, %s2428_s7 }
  0x90   : > { %1086 = vrot.lane.b32.xlu1 %v2680_v20, %s2428_s7 }
  0x93   : > { %1088 = vrot.lane.b32.xlu0 %v1083_v27, %s2428_s7 }
  0x94   : > { %1128 = vrot.lane.b32.xlu1 %v1380_v8, %s2429_s13 }
  0x97   : > { %1130 = vrot.lane.b32.xlu0 %v1387_v14, %s2429_s13 }
  0x98   : > { %1132 = vrot.lane.b32.xlu1 %v2054_v6, %s2429_s13 }
  0x9b   : > { %1173 = vrot.lane.b32.xlu0 %v1424_v10, %s2430_s12 }
  0x9c   : > { %1175 = vrot.lane.b32.xlu1 %v1380_v8, %s2430_s12 }
  0x9f   : > { %1177 = vrot.lane.b32.xlu0 %v1172_v29, %s2430_s12 }
  0xa0   : > { %861 = vrot.lane.b32.xlu1 %v2680_v20, %s2431_s14 }
  0xa3   : > { %863 = vrot.lane.b32.xlu0 %v2684_v22, %s2431_s14 }
  0xa4   : > { %865 = vrot.lane.b32.xlu1 %v2687_v24, %s2431_s14 }
  0xa7   : > { %906 = vrot.lane.b32.xlu0 %v2692_v25, %s2432_s9 }
  0xa8   : > { %908 = vrot.lane.b32.xlu1 %v2680_v20, %s2432_s9 }
  0xab   : > { %910 = vrot.lane.b32.xlu0 %v905_v31, %s2432_s9 }
  0xac   : > { %950 = vrot.lane.b32.xlu1 %v2680_v20, %s2433_s29 }
  0xaf   : > { %952 = vrot.lane.b32.xlu0 %v2684_v22, %s2433_s29 }
  0xb0   : > { %954 = vrot.lane.b32.xlu1 %v2687_v24, %s2433_s29  ;;  %s2949_s29 = scalar_lea.vmem %s2906_s3, %s2566_s19 }
  0xb3   : > { %995 = vrot.lane.b32.xlu0 %v2692_v25, %s2434_s21 }
  0xb4   : > { %997 = vrot.lane.b32.xlu1 %v2680_v20, %s2434_s21 }
  0xb7   : > { %999 = vrot.lane.b32.xlu0 %v994_v33, %s2434_s21 }
  0xb8   : > { %683 = vrot.lane.b32.xlu1 %v2680_v20, %s2435_s23 }
  0xbb   : > { %685 = vrot.lane.b32.xlu0 %v2684_v22, %s2435_s23 }
  0xbc   : > { %687 = vrot.lane.b32.xlu1 %v2687_v24, %s2435_s23 }
  0xbf   : > { %728 = vrot.lane.b32.xlu0 %v2692_v25, %s2436_s6 }
  0xc0   : > { %730 = vrot.lane.b32.xlu1 %v2680_v20, %s2436_s6 }
  0xc3   : > { %732 = vrot.lane.b32.xlu0 %v727_v35, %s2436_s6 }
  0xc4   : > { %772 = vrot.lane.b32.xlu1 %v2680_v20, %s2437_s28 }
  0xc7   : > { %774 = vrot.lane.b32.xlu0 %v2684_v22, %s2437_s28 }
  0xc8   : > { %776 = vrot.lane.b32.xlu1 %v2687_v24, %s2437_s28 }
  0xcb   : > { %817 = vrot.lane.b32.xlu0 %v2692_v25, %s2438_s4 }
  0xcc   : > { %819 = vrot.lane.b32.xlu1 %v2680_v20, %s2438_s4 }
  0xcf   : > { %821 = vrot.lane.b32.xlu0 %v816_v37, %s2438_s4 }
  0xd0   : > { %505 = vrot.lane.b32.xlu1 %v2680_v20, %s2439_s10 }
  0xd1   : > { %v1489_v38 = vpop.permute.xlu0 %1488 }
  0xd2   : > { %v1400_v39 = vpop.permute.xlu1 %1399  ;;  %v1492_v55 = vrot.slane %v1489_v38, 4 }
  0xd3   : > { %507 = vrot.lane.b32.xlu0 %v2684_v22, %s2439_s10  ;;  %v1403_v56 = vrot.slane %v1400_v39, 4 }
  0xd4   : > { %509 = vrot.lane.b32.xlu1 %v2687_v24, %s2439_s10 }
  0xd5   : > { %v1396_v41 = vpop.permute.xlu0 %1395 }
  0xd6   : > { %v2732_v42 = vpop.permute.xlu1 %1217  ;;  %v1401_v60 = vrot.slane %v1396_v41, 4 }
  0xd7   : > { %550 = vrot.lane.b32.xlu0 %v2692_v25, %s2440_s20  ;;  %v1223_v16 = vrot.slane %v2732_v42, 4 }
  0xd8   : > { %552 = vrot.lane.b32.xlu1 %v2680_v20, %s2440_s20 }
  0xd9   : > { %v1443_v44 = vpop.permute.xlu0 %1442 }
  0xda   : > { %v1441_v45 = vpop.permute.xlu1 %1440  ;;  %v1447_v46 = vrot.slane %v1443_v44, 4 }
  0xdb   : > { %v1446_v47 = vrot.slane %v1441_v45, 4  ;;  %554 = vrot.lane.b32.xlu0 %v549_v43, %s2440_s20 }
  0xdc   : > { %594 = vrot.lane.b32.xlu1 %v2680_v20, %s2441_s5 }
  0xdd   : > { %v1449_v48 = vsel %vm380_vm0, %v1446_v47, %v1447_v46  ;;  %v1485_v50 = vpop.permute.xlu0 %1484 }
  0xde   : > { %v1451_v49 = vsel %vm1450_vm1, %v1441_v45, %v1449_v48  ;;  %v1445_v51 = vpop.permute.xlu1 %1444  ;;  %v1490_v61 = vrot.slane %v1485_v50, 4 }
  0xdf   : > { %1456 = vst [vmem:[#allocation3 + $0xc0] sm:$0xcc] %v1451_v49  ;;  %v1448_v52 = vrot.slane %v1445_v51, 4  ;;  %596 = vrot.lane.b32.xlu0 %v2684_v22, %s2441_s5 }
  0xe0   : > { %598 = vrot.lane.b32.xlu1 %v2687_v24, %s2441_s5 }
  0xe1   : > { %v1452_v54 = vsel %vm380_vm0, %v1447_v46, %v1448_v52  ;;  %v1398_v58 = vpop.permute.xlu0 %1397 }
  0xe2   : > { %v1453_v57 = vsel %vm1450_vm1, %v1443_v44, %v1452_v54  ;;  %v1487_v59 = vpop.permute.xlu1 %1486  ;;  %v1402_v62 = vrot.slane %v1398_v58, 4  ;;  %vm1005_vm1 = vcmask 64512  }
  0xe3   : > { %1457 = vst [vmem:[#allocation3 + $0xc8] sm:$0xcc] %v1453_v57  ;;  %v1491_v63 = vrot.slane %v1487_v59, 4  ;;  %639 = vrot.lane.b32.xlu0 %v2692_v25, %s2442_s11 }
  0xe4   : > { %641 = vrot.lane.b32.xlu1 %v2680_v20, %s2442_s11  ;;  %v1404_v6 = vsel %vm380_vm0, %v1401_v60, %v1402_v62  ;;  %v1407_v7 = vsel %vm380_vm0, %v1402_v62, %v1403_v56 }
  0xe5   : > { %v1493_v8 = vsel %vm380_vm0, %v1490_v61, %v1491_v63  ;;  %v1496_v9 = vsel %vm380_vm0, %v1491_v63, %v1492_v55  ;;  %v1406_v10 = vsel %vm1405_vm2, %v1396_v41, %v1404_v6  ;;  %v1408_v11 = vsel %vm1405_vm2, %v1398_v58, %v1407_v7  ;;  %v1220_v15 = vpop.permute.xlu0 %1219  ;;  %v1531_v63 = vld [vmem:[%s2905_s2] sm:$0xff] }
  0xe6   : > { %v1495_v12 = vsel %vm1494_vm3, %v1485_v50, %v1493_v8  ;;  %v1497_v13 = vsel %vm1494_vm3, %v1487_v59, %v1496_v9  ;;  %v1222_v14 = vpop.permute.xlu1 %1221  ;;  %1411 = vst [vmem:[#allocation3 + $0xc0] sm:$0x33] %v1406_v10  ;;  %1412 = vst [vmem:[#allocation3 + $0xc8] sm:$0x33] %v1408_v11  ;;  %v1224_v18 = vrot.slane %v1220_v15, 4  ;;  %v2446_v61 = vmov 0  }
  0xe7   : > { %1500 = vst [vmem:[#allocation3 + $0xd0] sm:$0x33] %v1495_v12  ;;  %1501 = vst [vmem:[#allocation3 + $0xd8] sm:$0x33] %v1497_v13  ;;  %v1225_v17 = vrot.slane %v1222_v14, 4  ;;  %643 = vrot.lane.b32.xlu0 %v638_v1, %s2442_s11  ;;  %1722 = vmatprep.mubr.bf16.mxu0 %v2446_v61  ;;  %vm693_vm2 = vcmask 867328  }
  0xe8   : > { %371 = vrot.lane.b32.xlu1 %v2692_v25, %s2443_s15  ;;  %v1226_v21 = vsel %vm380_vm0, %v1223_v16, %v1224_v18  ;;  %1763 = vmatprep.mubr.bf16.mxu1 %v2446_v61  ;;  %vm738_vm3 = vcmask 228352  }
  0xe9   : > { %v1229_v23 = vsel %vm380_vm0, %v1224_v18, %v1225_v17  ;;  %v1228_v26 = vsel %vm1227_vm4, %v2732_v42, %v1226_v21  ;;  %v1263_v29 = vpop.permute.xlu0 %1262  ;;  %v2234_v42 = vld [vmem:[%s2600_s27 + $0x8] ss:$0 sps:$4 sm:$0x33]   ;;  %s2445_s27 = smov 118   ;;  %2211 = vset.pattern.permute.xlu0 %v2446_v61 }
  0xea   : > { %v1230_v27 = vsel %vm1227_vm4, %v1220_v15, %v1229_v23  ;;  %v1265_v28 = vpop.permute.xlu1 %1264  ;;  %1233 = vst [vmem:[#allocation3 + $0xa0] sm:$0x33] %v1228_v26  ;;  %v1268_v31 = vrot.slane %v1263_v29, 4  ;;  %v460_v52 = vrot.slane %v2234_v42, %v2665_v5  ;;  %vm782_vm4 = vcmask 220160  }
  0xeb   : > { %1234 = vst [vmem:[#allocation3 + $0xa8] sm:$0x33] %v1230_v27  ;;  %v1269_v30 = vrot.slane %v1265_v28, 4  ;;  %373 = vrot.lane.b32.xlu0 %v2680_v20, %s2443_s15 }
  0xec   : > { %375 = vrot.lane.b32.xlu1 %v370_v19, %s2443_s15 }
  0xed   : > { %v1271_v32 = vsel %vm380_vm0, %v1268_v31, %v1269_v30  ;;  %v1267_v35 = vpop.permute.xlu0 %1266 }
  0xee   : > { %v1273_v33 = vsel %vm1272_vm5, %v1263_v29, %v1271_v32  ;;  %v1307_v34 = vpop.permute.xlu1 %1306  ;;  %v2228_v36 = vld [vmem:[#allocation3 + $0xc4] ss:$16 sps:$4 sm:$0x3f]   ;;  %v1270_v37 = vrot.slane %v1267_v35, 4 }
  0xef   : > { %1278 = vst [vmem:[#allocation3 + $0xa0] sm:$0xcc] %v1273_v33  ;;  %416 = vrot.lane.b32.xlu0 %v2680_v20, %s2444_s18  ;;  %v2230_v38 = vld [vmem:[#allocation3 + $0xcc] ss:$16 sps:$4 sm:$0x3f]   ;;  %2083 = vmatprep.subr.msk.bf16.mxu0 %vm1677_vm6, %v2228_v36  ;;  %v1312_v47 = vrot.slane %v1307_v34, 4 }
  0xf0   : > { %418 = vrot.lane.b32.xlu1 %v2684_v22, %s2444_s18  ;;  %v2232_v39 = vld [vmem:[#allocation3 + $0xc0] ss:$16 sps:$4 sm:$0x3f]   ;;  %v1274_v40 = vsel %vm380_vm0, %v1269_v30, %v1270_v37  ;;  %v2233_v41 = vld [vmem:[#allocation3 + $0xc8] ss:$16 sps:$4 sm:$0x3f]   ;;  %2085 = vmatprep.subr.msk.bf16.mxu1 %vm1677_vm6, %v2230_v38 }
  0xf1   : > { %v1275_v43 = vsel %vm1272_vm5, %v1265_v28, %v1274_v40  ;;  %v1679_v44 = vsel %vm1677_vm6, %v2232_v39, 0  ;;  %v1309_v46 = vpop.permute.xlu0 %1308  ;;  %v1685_v22 = vsel %vm1677_vm6, %v2233_v41, 0  ;;  %vm827_vm5 = vcmask 211968  }
  0xf2   : > { %v1311_v45 = vpop.permute.xlu1 %1310  ;;  %1279 = vst [vmem:[#allocation3 + $0xa8] sm:$0xcc] %v1275_v43  ;;  %1693 = vmatpush1.bf16.msra.mxu0 %v1679_v44  ;;  %v1313_v49 = vrot.slane %v1309_v46, 4  ;;  %1734 = vmatpush1.bf16.msra.mxu1 %v1685_v22  ;;  %vm515_vm6 = vcmask 957440  }
  0xf3   : > { %v1314_v48 = vrot.slane %v1311_v45, 4  ;;  %420 = vrot.lane.b32.xlu0 %v2687_v24, %s2444_s18 }
  0xf4   : > { %v1315_v50 = vsel %vm380_vm0, %v1312_v47, %v1313_v49  ;;  %461 = vrot.lane.b32.xlu1 %v2692_v25, %s2445_s27 }
  0xf5   : > { %v1318_v51 = vsel %vm380_vm0, %v1313_v49, %v1314_v48  ;;  %v1317_v53 = vsel %vm1316_vm7, %v1307_v34, %v1315_v50  ;;  %v1352_v56 = vpop.permute.xlu0 %1351 }
  0xf6   : > { %v1319_v54 = vsel %vm1316_vm7, %v1309_v46, %v1318_v51  ;;  %v1354_v55 = vpop.permute.xlu1 %1353  ;;  %1322 = vst [vmem:[#allocation3 + $0xb0] sm:$0x33] %v1317_v53  ;;  %v1357_v24 = vrot.slane %v1352_v56, 4  ;;  %vm560_vm7 = vcmask 949248  }
  0xf7   : > { %1323 = vst [vmem:[#allocation3 + $0xb8] sm:$0x33] %v1319_v54  ;;  %v1358_v57 = vrot.slane %v1354_v55, 4  ;;  %463 = vrot.lane.b32.xlu0 %v2680_v20, %s2445_s27 }
  0xf8   : > { %465 = vrot.lane.b32.xlu1 %v460_v52, %s2445_s27 }
  0xf9   : > { %v1360_v58 = vsel %vm380_vm0, %v1357_v24, %v1358_v57  ;;  %v1356_v59 = vpop.permute.xlu0 %1355 }
  0xfa   : > { %v1362_v25 = vsel %vm1361_vm8, %v1352_v56, %v1360_v58  ;;  %v1040_v5 = vpop.permute.xlu1 %1039  ;;  %v1359_v60 = vrot.slane %v1356_v59, 4 }
  0xfb   : > { %1367 = vst [vmem:[#allocation3 + $0xb0] sm:$0xcc] %v1362_v25  ;;  %1534 = vperm.xlu0 %2211, %v1531_v63   ;;  %v1045_v2 = vrot.slane %v1040_v5, 4 }
  0xfc   : > { %v1363_v62 = vsel %vm380_vm0, %v1358_v57, %v1359_v60 }
  0xfd   : > { %v1364_v20 = vsel %vm1361_vm8, %v1354_v55, %v1363_v62  ;;  %v1042_v1 = vpop.permute.xlu0 %1041  ;;  %vm604_vm8 = vcmask 883712  }
  0xfe   : > { %v1044_v0 = vpop.permute.xlu1 %1043  ;;  %1368 = vst [vmem:[#allocation3 + $0xb8] sm:$0xcc] %v1364_v20  ;;  %v1046_v6 = vrot.slane %v1042_v1, 4 }
  0xff   : > { %v1047_v3 = vrot.slane %v1044_v0, 4 }
 0x100   : > { %v1048_v7 = vsel %vm380_vm0, %v1045_v2, %v1046_v6 }
 0x101   : > { %v1051_v8 = vsel %vm380_vm0, %v1046_v6, %v1047_v3  ;;  %v1050_v9 = vsel %vm1049_vm9, %v1040_v5, %v1048_v7  ;;  %v1085_v12 = vpop.permute.xlu0 %1084 }
 0x102   : > { %v1052_v10 = vsel %vm1049_vm9, %v1042_v1, %v1051_v8  ;;  %v1087_v11 = vpop.permute.xlu1 %1086  ;;  %v2235_v13 = vld [vmem:[#allocation3 + $0xa4] ss:$16 sps:$4 sm:$0xff]   ;;  %v2237_v14 = vld [vmem:[#allocation3 + $0xa0] ss:$16 sps:$4 sm:$0xff]   ;;  %1055 = vst [vmem:[#allocation3 + $0x80] sm:$0x33] %v1050_v9 }
 0x103   : > { %1056 = vst [vmem:[#allocation3 + $0x88] sm:$0x33] %v1052_v10  ;;  %v1091_v15 = vrot.slane %v1087_v11, 4  ;;  %v1090_v16 = vrot.slane %v1085_v12, 4  ;;  %1694 = vmatprep.subr.bf16.mxu0 %v2235_v13  ;;  %vm649_vm9 = vcmask 875520  }
 0x104   : > { %1695 = vmatpush1.bf16.msra.mxu0 %v2237_v14 }
 0x105   : > { %v1093_v17 = vsel %vm380_vm0, %v1090_v16, %v1091_v15  ;;  %v1089_v21 = vpop.permute.xlu0 %1088  ;;  %v2238_v23 = vld [vmem:[#allocation3 + $0xac] ss:$16 sps:$4 sm:$0xff]   ;;  %v2240_v26 = vld [vmem:[#allocation3 + $0xa8] ss:$16 sps:$4 sm:$0xff]  }
 0x106   : > { %v1095_v18 = vsel %vm1094_vm10, %v1085_v12, %v1093_v17  ;;  %v1129_v19 = vpop.permute.xlu1 %1128  ;;  %v1092_v27 = vrot.slane %v1089_v21, 4  ;;  %1735 = vmatprep.subr.bf16.mxu1 %v2238_v23 }
 0x107   : > { %1100 = vst [vmem:[#allocation3 + $0x80] sm:$0xcc] %v1095_v18  ;;  %1736 = vmatpush1.bf16.msra.mxu1 %v2240_v26  ;;  %v1134_v32 = vrot.slane %v1129_v19, 4 }
 0x108   : > { %v1096_v28 = vsel %vm380_vm0, %v1091_v15, %v1092_v27 }
 0x109   : > { %v1097_v29 = vsel %vm1094_vm10, %v1087_v11, %v1096_v28  ;;  %v1131_v31 = vpop.permute.xlu0 %1130  ;;  %vm382_vm10 = vcmask 1039360  }
 0x10a   : > { %v1133_v30 = vpop.permute.xlu1 %1132  ;;  %1101 = vst [vmem:[#allocation3 + $0x88] sm:$0xcc] %v1097_v29  ;;  %v1135_v34 = vrot.slane %v1131_v31, 4 }
 0x10b   : > { %v1136_v33 = vrot.slane %v1133_v30, 4 }
 0x10c   : > { %v1137_v35 = vsel %vm380_vm0, %v1134_v32, %v1135_v34 }
 0x10d   : > { %v1140_v36 = vsel %vm380_vm0, %v1135_v34, %v1136_v33  ;;  %v1139_v37 = vsel %vm1138_vm11, %v1129_v19, %v1137_v35  ;;  %v1174_v40 = vpop.permute.xlu0 %1173 }
 0x10e   : > { %v1141_v38 = vsel %vm1138_vm11, %v1131_v31, %v1140_v36  ;;  %v1176_v39 = vpop.permute.xlu1 %1175  ;;  %1144 = vst [vmem:[#allocation3 + $0x90] sm:$0x33] %v1139_v37  ;;  %v1179_v42 = vrot.slane %v1174_v40, 4  ;;  %vm426_vm11 = vcmask 1031168  }
 0x10f   : > { %1145 = vst [vmem:[#allocation3 + $0x98] sm:$0x33] %v1141_v38  ;;  %v1180_v41 = vrot.slane %v1176_v39, 4 }
 0x111   : > { %v1182_v43 = vsel %vm380_vm0, %v1179_v42, %v1180_v41  ;;  %v1178_v45 = vpop.permute.xlu0 %1177 }
 0x112   : > { %v1184_v44 = vsel %vm1183_vm12, %v1174_v40, %v1182_v43  ;;  %v862_v46 = vpop.permute.xlu1 %861  ;;  %v1181_v47 = vrot.slane %v1178_v45, 4 }
 0x113   : > { %1189 = vst [vmem:[#allocation3 + $0x90] sm:$0xcc] %v1184_v44  ;;  %v867_v51 = vrot.slane %v862_v46, 4 }
 0x114   : > { %v1185_v22 = vsel %vm380_vm0, %v1180_v41, %v1181_v47 }
 0x115   : > { %v1186_v48 = vsel %vm1183_vm12, %v1176_v39, %v1185_v22  ;;  %v864_v50 = vpop.permute.xlu0 %863  ;;  %vm471_vm12 = vcmask 965632  }
 0x116   : > { %v866_v49 = vpop.permute.xlu1 %865  ;;  %1190 = vst [vmem:[#allocation3 + $0x98] sm:$0xcc] %v1186_v48  ;;  %v868_v53 = vrot.slane %v864_v50, 4 }
 0x117   : > { %v869_v52 = vrot.slane %v866_v49, 4 }
 0x118   : > { %v870_v54 = vsel %vm380_vm0, %v867_v51, %v868_v53 }
 0x119   : > { %v873_v55 = vsel %vm380_vm0, %v868_v53, %v869_v52  ;;  %v872_v56 = vsel %vm871_vm13, %v862_v46, %v870_v54  ;;  %v907_v58 = vpop.permute.xlu0 %906 }
 0x11a   : > { %v874_v57 = vsel %vm871_vm13, %v864_v50, %v873_v55  ;;  %v909_v24 = vpop.permute.xlu1 %908  ;;  %v2241_v25 = vld [vmem:[#allocation3 + $0x84] ss:$16 sps:$4 sm:$0xff]   ;;  %v2243_v59 = vld [vmem:[#allocation3 + $0x80] ss:$16 sps:$4 sm:$0xff]   ;;  %877 = vst [vmem:[#allocation3 + $0x60] sm:$0x33] %v872_v56 }
 0x11b   : > { %878 = vst [vmem:[#allocation3 + $0x68] sm:$0x33] %v874_v57  ;;  %v913_v5 = vrot.slane %v909_v24, 4  ;;  %v912_v60 = vrot.slane %v907_v58, 4  ;;  %1696 = vmatprep.subr.bf16.mxu0 %v2241_v25 }
 0x11c   : > { %1697 = vmatpush1.bf16.msra.mxu0 %v2243_v59 }
 0x11d   : > { %v915_v61 = vsel %vm380_vm0, %v912_v60, %v913_v5  ;;  %v911_v20 = vpop.permute.xlu0 %910  ;;  %v2244_v0 = vld [vmem:[#allocation3 + $0x8c] ss:$16 sps:$4 sm:$0xff]   ;;  %v2246_v1 = vld [vmem:[#allocation3 + $0x88] ss:$16 sps:$4 sm:$0xff]  }
 0x11e   : > { %v917_v62 = vsel %vm916_vm14, %v907_v58, %v915_v61  ;;  %v951_v63 = vpop.permute.xlu1 %950  ;;  %v914_v2 = vrot.slane %v911_v20, 4  ;;  %1737 = vmatprep.subr.bf16.mxu1 %v2244_v0 }
 0x11f   : > { %922 = vst [vmem:[#allocation3 + $0x60] sm:$0xcc] %v917_v62  ;;  %1738 = vmatpush1.bf16.msra.mxu1 %v2246_v1  ;;  %v956_v9 = vrot.slane %v951_v63, 4 }
 0x120   : > { %v918_v3 = vsel %vm380_vm0, %v913_v5, %v914_v2 }
 0x121   : > { %v919_v6 = vsel %vm916_vm14, %v909_v24, %v918_v3  ;;  %v953_v8 = vpop.permute.xlu0 %952 }
 0x122   : > { %v955_v7 = vpop.permute.xlu1 %954  ;;  %923 = vst [vmem:[#allocation3 + $0x68] sm:$0xcc] %v919_v6  ;;  %v957_v11 = vrot.slane %v953_v8, 4 }
 0x123   : > { %v958_v10 = vrot.slane %v955_v7, 4 }
 0x124   : > { %v959_v12 = vsel %vm380_vm0, %v956_v9, %v957_v11 }
 0x125   : > { %v962_v13 = vsel %vm380_vm0, %v957_v11, %v958_v10  ;;  %v961_v14 = vsel %vm960_vm15, %v951_v63, %v959_v12  ;;  %v996_v17 = vpop.permute.xlu0 %995 }
 0x126   : > { %v963_v15 = vsel %vm960_vm15, %v953_v8, %v962_v13  ;;  %v998_v16 = vpop.permute.xlu1 %997  ;;  %966 = vst [vmem:[#allocation3 + $0x70] sm:$0x33] %v961_v14  ;;  %v1001_v19 = vrot.slane %v996_v17, 4 }
 0x127   : > { %967 = vst [vmem:[#allocation3 + $0x78] sm:$0x33] %v963_v15  ;;  %v1002_v18 = vrot.slane %v998_v16, 4 }
 0x129   : > { %v1004_v21 = vsel %vm380_vm0, %v1001_v19, %v1002_v18  ;;  %v1000_v26 = vpop.permute.xlu0 %999 }
 0x12a   : > { %v1006_v23 = vsel %vm1005_vm1, %v996_v17, %v1004_v21  ;;  %v684_v27 = vpop.permute.xlu1 %683  ;;  %v1003_v28 = vrot.slane %v1000_v26, 4 }
 0x12b   : > { %1011 = vst [vmem:[#allocation3 + $0x70] sm:$0xcc] %v1006_v23  ;;  %v689_v33 = vrot.slane %v684_v27, 4 }
 0x12c   : > { %v1007_v29 = vsel %vm380_vm0, %v1002_v18, %v1003_v28 }
 0x12d   : > { %v1008_v30 = vsel %vm1005_vm1, %v998_v16, %v1007_v29  ;;  %v686_v32 = vpop.permute.xlu0 %685 }
 0x12e   : > { %v688_v31 = vpop.permute.xlu1 %687  ;;  %1012 = vst [vmem:[#allocation3 + $0x78] sm:$0xcc] %v1008_v30  ;;  %v690_v35 = vrot.slane %v686_v32, 4 }
 0x12f   : > { %v691_v34 = vrot.slane %v688_v31, 4 }
 0x130   : > { %v692_v36 = vsel %vm380_vm0, %v689_v33, %v690_v35 }
 0x131   : > { %v695_v37 = vsel %vm380_vm0, %v690_v35, %v691_v34  ;;  %v694_v38 = vsel %vm693_vm2, %v684_v27, %v692_v36  ;;  %v729_v41 = vpop.permute.xlu0 %728 }
 0x132   : > { %v696_v39 = vsel %vm693_vm2, %v686_v32, %v695_v37  ;;  %v731_v40 = vpop.permute.xlu1 %730  ;;  %v2247_v42 = vld [vmem:[#allocation3 + $0x64] ss:$16 sps:$4 sm:$0xff]   ;;  %v2249_v43 = vld [vmem:[#allocation3 + $0x60] ss:$16 sps:$4 sm:$0xff]   ;;  %699 = vst [vmem:[#allocation3 + $0x40] sm:$0x33] %v694_v38 }
 0x133   : > { %700 = vst [vmem:[#allocation3 + $0x48] sm:$0x33] %v696_v39  ;;  %v735_v44 = vrot.slane %v731_v40, 4  ;;  %v734_v45 = vrot.slane %v729_v41, 4  ;;  %1698 = vmatprep.subr.bf16.mxu0 %v2247_v42 }
 0x134   : > { %1699 = vmatpush1.bf16.msra.mxu0 %v2249_v43 }
 0x135   : > { %v737_v46 = vsel %vm380_vm0, %v734_v45, %v735_v44  ;;  %v733_v48 = vpop.permute.xlu0 %732  ;;  %v2250_v49 = vld [vmem:[#allocation3 + $0x6c] ss:$16 sps:$4 sm:$0xff]   ;;  %v2252_v50 = vld [vmem:[#allocation3 + $0x68] ss:$16 sps:$4 sm:$0xff]  }
 0x136   : > { %v739_v47 = vsel %vm738_vm3, %v729_v41, %v737_v46  ;;  %v773_v22 = vpop.permute.xlu1 %772  ;;  %v736_v51 = vrot.slane %v733_v48, 4  ;;  %1739 = vmatprep.subr.bf16.mxu1 %v2250_v49 }
 0x137   : > { %744 = vst [vmem:[#allocation3 + $0x40] sm:$0xcc] %v739_v47  ;;  %1740 = vmatpush1.bf16.msra.mxu1 %v2252_v50  ;;  %v778_v56 = vrot.slane %v773_v22, 4 }
 0x138   : > { %v740_v52 = vsel %vm380_vm0, %v735_v44, %v736_v51 }
 0x139   : > { %v741_v53 = vsel %vm738_vm3, %v731_v40, %v740_v52  ;;  %v775_v55 = vpop.permute.xlu0 %774 }
 0x13a   : > { %v777_v54 = vpop.permute.xlu1 %776  ;;  %745 = vst [vmem:[#allocation3 + $0x48] sm:$0xcc] %v741_v53  ;;  %v779_v24 = vrot.slane %v775_v55, 4 }
 0x13b   : > { %v780_v57 = vrot.slane %v777_v54, 4 }
 0x13c   : > { %v781_v58 = vsel %vm380_vm0, %v778_v56, %v779_v24 }
 0x13d   : > { %v784_v25 = vsel %vm380_vm0, %v779_v24, %v780_v57  ;;  %v783_v59 = vsel %vm782_vm4, %v773_v22, %v781_v58  ;;  %v818_v61 = vpop.permute.xlu0 %817 }
 0x13e   : > { %v785_v5 = vsel %vm782_vm4, %v775_v55, %v784_v25  ;;  %v820_v60 = vpop.permute.xlu1 %819  ;;  %788 = vst [vmem:[#allocation3 + $0x50] sm:$0x33] %v783_v59  ;;  %v823_v63 = vrot.slane %v818_v61, 4 }
 0x13f   : > { %789 = vst [vmem:[#allocation3 + $0x58] sm:$0x33] %v785_v5  ;;  %v824_v62 = vrot.slane %v820_v60, 4 }
 0x141   : > { %v826_v20 = vsel %vm380_vm0, %v823_v63, %v824_v62  ;;  %v822_v1 = vpop.permute.xlu0 %821 }
 0x142   : > { %v828_v0 = vsel %vm827_vm5, %v818_v61, %v826_v20  ;;  %v506_v2 = vpop.permute.xlu1 %505  ;;  %v825_v3 = vrot.slane %v822_v1, 4 }
 0x143   : > { %833 = vst [vmem:[#allocation3 + $0x50] sm:$0xcc] %v828_v0  ;;  %v511_v10 = vrot.slane %v506_v2, 4 }
 0x144   : > { %v829_v6 = vsel %vm380_vm0, %v824_v62, %v825_v3 }
 0x145   : > { %v830_v7 = vsel %vm827_vm5, %v820_v60, %v829_v6  ;;  %v508_v9 = vpop.permute.xlu0 %507 }
 0x146   : > { %v510_v8 = vpop.permute.xlu1 %509  ;;  %834 = vst [vmem:[#allocation3 + $0x58] sm:$0xcc] %v830_v7  ;;  %v512_v12 = vrot.slane %v508_v9, 4 }
 0x147   : > { %v513_v11 = vrot.slane %v510_v8, 4 }
 0x148   : > { %v514_v13 = vsel %vm380_vm0, %v511_v10, %v512_v12 }
 0x149   : > { %v517_v14 = vsel %vm380_vm0, %v512_v12, %v513_v11  ;;  %v516_v15 = vsel %vm515_vm6, %v506_v2, %v514_v13  ;;  %v551_v18 = vpop.permute.xlu0 %550 }
 0x14a   : > { %v518_v16 = vsel %vm515_vm6, %v508_v9, %v517_v14  ;;  %v553_v17 = vpop.permute.xlu1 %552  ;;  %v2253_v19 = vld [vmem:[#allocation3 + $0x44] ss:$16 sps:$4 sm:$0xff]   ;;  %v2255_v21 = vld [vmem:[#allocation3 + $0x40] ss:$16 sps:$4 sm:$0xff]   ;;  %521 = vst [vmem:[#allocation3 + $0x20] sm:$0x33] %v516_v15 }
 0x14b   : > { %522 = vst [vmem:[#allocation3 + $0x28] sm:$0x33] %v518_v16  ;;  %v557_v23 = vrot.slane %v553_v17, 4  ;;  %v556_v26 = vrot.slane %v551_v18, 4  ;;  %1700 = vmatprep.subr.bf16.mxu0 %v2253_v19 }
 0x14c   : > { %1701 = vmatpush1.bf16.msra.mxu0 %v2255_v21 }
 0x14d   : > { %v559_v27 = vsel %vm380_vm0, %v556_v26, %v557_v23  ;;  %v555_v30 = vpop.permute.xlu0 %554  ;;  %v2256_v31 = vld [vmem:[#allocation3 + $0x4c] ss:$16 sps:$4 sm:$0xff]   ;;  %v2258_v32 = vld [vmem:[#allocation3 + $0x48] ss:$16 sps:$4 sm:$0xff]  }
 0x14e   : > { %v561_v28 = vsel %vm560_vm7, %v551_v18, %v559_v27  ;;  %v595_v29 = vpop.permute.xlu1 %594  ;;  %v558_v33 = vrot.slane %v555_v30, 4  ;;  %1741 = vmatprep.subr.bf16.mxu1 %v2256_v31 }
 0x14f   : > { %566 = vst [vmem:[#allocation3 + $0x20] sm:$0xcc] %v561_v28  ;;  %1742 = vmatpush1.bf16.msra.mxu1 %v2258_v32  ;;  %v600_v38 = vrot.slane %v595_v29, 4  ;;  %v1502_v32 = vld [vmem:[%s2904_s1] sm:$0xf] }
 0x150   : > { %v562_v34 = vsel %vm380_vm0, %v557_v23, %v558_v33  ;;  %v1794_v33 = vsub.s32 0, %v2662_v4 }
 0x151   : > { %v563_v35 = vsel %vm560_vm7, %v553_v17, %v562_v34  ;;  %v597_v37 = vpop.permute.xlu0 %596  ;;  %v1790_v34 = vld [vmem:[%s2949_s29] sm:$0xf] }
 0x152   : > { %v599_v36 = vpop.permute.xlu1 %598  ;;  %567 = vst [vmem:[#allocation3 + $0x28] sm:$0xcc] %v563_v35  ;;  %v601_v40 = vrot.slane %v597_v37, 4  ;;  %v1802_v35 = vsub.s32 2, %v2662_v4 }
 0x153   : > { %v602_v39 = vrot.slane %v599_v36, 4  ;;  %v1798_v36 = vsub.s32 1, %v2662_v4 }
 0x154   : > { %v603_v41 = vsel %vm380_vm0, %v600_v38, %v601_v40  ;;  %v1806_v38 = vsub.s32 3, %v2662_v4 }
 0x155   : > { %v606_v42 = vsel %vm380_vm0, %v601_v40, %v602_v39  ;;  %v605_v43 = vsel %vm604_vm8, %v595_v29, %v603_v41  ;;  %v640_v46 = vpop.permute.xlu0 %639  ;;  %v1795_v39 = vrot.slane %v1790_v34, %v1794_v33  ;;  %v1803_v41 = vrot.slane %v1790_v34, %v1802_v35 }
 0x156   : > { %v607_v44 = vsel %vm604_vm8, %v597_v37, %v606_v42  ;;  %v642_v45 = vpop.permute.xlu1 %641  ;;  %610 = vst [vmem:[#allocation3 + $0x30] sm:$0x33] %v605_v43  ;;  %v645_v22 = vrot.slane %v640_v46, 4 }
 0x157   : > { %611 = vst [vmem:[#allocation3 + $0x38] sm:$0x33] %v607_v44  ;;  %v646_v47 = vrot.slane %v642_v45, 4  ;;  %v1799_v44 = vrot.slane %v1790_v34, %v1798_v36 }
 0x159   : > { %v648_v48 = vsel %vm380_vm0, %v645_v22, %v646_v47  ;;  %v644_v50 = vpop.permute.xlu0 %643 }
 0x15a   : > { %v650_v49 = vsel %vm649_vm9, %v640_v46, %v648_v48  ;;  %v372_v51 = vpop.permute.xlu1 %371  ;;  %v647_v52 = vrot.slane %v644_v50, 4 }
 0x15b   : > { %655 = vst [vmem:[#allocation3 + $0x30] sm:$0xcc] %v650_v49  ;;  %v377_v57 = vrot.slane %v372_v51, 4 }
 0x15c   : > { %v651_v53 = vsel %vm380_vm0, %v646_v47, %v647_v52  ;;  %v1807_v47 = vrot.slane %v1790_v34, %v1806_v38 }
 0x15d   : > { %v652_v54 = vsel %vm649_vm9, %v642_v45, %v651_v53  ;;  %v374_v55 = vpop.permute.xlu0 %373 }
 0x15e   : > { %v376_v56 = vpop.permute.xlu1 %375  ;;  %656 = vst [vmem:[#allocation3 + $0x38] sm:$0xcc] %v652_v54  ;;  %v378_v24 = vrot.slane %v374_v55, 4 }
 0x15f   : > { %v379_v58 = vrot.slane %v376_v56, 4 }
 0x160   : > { %v381_v25 = vsel %vm380_vm0, %v377_v57, %v378_v24 }
 0x161   : > { %v384_v59 = vsel %vm380_vm0, %v378_v24, %v379_v58  ;;  %v383_v5 = vsel %vm382_vm10, %v372_v51, %v381_v25  ;;  %v417_v61 = vpop.permute.xlu0 %416 }
 0x162   : > { %v385_v60 = vsel %vm382_vm10, %v374_v55, %v384_v59  ;;  %v419_v62 = vpop.permute.xlu1 %418  ;;  %v2259_v63 = vld [vmem:[#allocation3 + $0x24] ss:$16 sps:$4 sm:$0xff]   ;;  %v2261_v20 = vld [vmem:[#allocation3 + $0x20] ss:$16 sps:$4 sm:$0xff]   ;;  %388 = vst [vmem:[#allocation3] sm:$0xcc] %v383_v5 }
 0x163   : > { %389 = vst [vmem:[#allocation3 + $0x8] sm:$0xcc] %v385_v60  ;;  %v422_v0 = vrot.slane %v417_v61, 4  ;;  %v423_v1 = vrot.slane %v419_v62, 4  ;;  %1702 = vmatprep.subr.bf16.mxu0 %v2259_v63 }
 0x164   : > { %1703 = vmatpush1.bf16.msra.mxu0 %v2261_v20 }
 0x165   : > { %v425_v2 = vsel %vm380_vm0, %v422_v0, %v423_v1  ;;  %v421_v6 = vpop.permute.xlu0 %420  ;;  %v2262_v7 = vld [vmem:[#allocation3 + $0x2c] ss:$16 sps:$4 sm:$0xff]   ;;  %v2264_v8 = vld [vmem:[#allocation3 + $0x28] ss:$16 sps:$4 sm:$0xff]  }
 0x166   : > { %v427_v3 = vsel %vm426_vm11, %v417_v61, %v425_v2  ;;  %v424_v9 = vrot.slane %v421_v6, 4  ;;  %v462_v10 = vpop.permute.xlu1 %461  ;;  %1743 = vmatprep.subr.bf16.mxu1 %v2262_v7 }
 0x167   : > { %432 = vst [vmem:[#allocation3 + $0x10] sm:$0x33] %v427_v3  ;;  %1744 = vmatpush1.bf16.msra.mxu1 %v2264_v8  ;;  %v467_v14 = vrot.slane %v462_v10, 4 }
 0x168   : > { %v428_v11 = vsel %vm380_vm0, %v423_v1, %v424_v9 }
 0x169   : > { %v429_v12 = vsel %vm426_vm11, %v419_v62, %v428_v11  ;;  %v464_v13 = vpop.permute.xlu0 %463  ;;  %v1503_v26 = vld [vmem:[#allocation3] sm:$0xff] }
 0x16a   : > { %433 = vst [vmem:[#allocation3 + $0x18] sm:$0x33] %v429_v12  ;;  %v468_v15 = vrot.slane %v464_v13, 4  ;;  %v466_v16 = vpop.permute.xlu1 %465 }
 0x16b   : > { %v469_v17 = vrot.slane %v466_v16, 4 }
 0x16c   : > { %v470_v18 = vsel %vm380_vm0, %v467_v14, %v468_v15 }
 0x16d   : > { %v472_v19 = vsel %vm471_vm12, %v462_v10, %v470_v18  ;;  %v473_v21 = vsel %vm380_vm0, %v468_v15, %v469_v17 }
 0x16e   : > { %477 = vst [vmem:[#allocation3 + $0x10] sm:$0xcc] %v472_v19  ;;  %v474_v23 = vsel %vm471_vm12, %v464_v13, %v473_v21 }
 0x16f   : > { %478 = vst [vmem:[#allocation3 + $0x18] sm:$0xcc] %v474_v23 }
 0x175   : > { %v1505_v27 = vld [vmem:[#allocation3 + $0x10] sm:$0xff] }
 0x176   : > { %v2265_v28 = vld [vmem:[#allocation3 + $0x4] ss:$16 sps:$4 sm:$0xff]   ;;  %v2267_v29 = vld [vmem:[#allocation3 + $0xc] ss:$16 sps:$4 sm:$0xff]   ;;  %v2055_v30 = vcombine.low %v1503_v26, %v1505_v27  ;;  %v2269_v31 = vld [vmem:[#allocation3 + $0x8] ss:$16 sps:$4 sm:$0xff]   ;;  %v1535_v37 = vpop.permute.xlu0 %1534 }
 0x177   : > { %1704 = vmatprep.subr.bf16.mxu0 %v2265_v28  ;;  %1745 = vmatprep.subr.bf16.mxu1 %v2267_v29 }
 0x178   : > { %1705 = vmatpush1.bf16.msra.mxu0 %v2055_v30  ;;  %1746 = vmatpush1.bf16.msra.mxu1 %v2269_v31 }
 0x17b   : > { %2084 = vmatmul.mubr.msk.bf16.vlgmr.msra.gmra.mxu0 %vm604_vm8, %v1502_v32  ;;  %2086 = vmatmul.mubr.msk.bf16.vlgmr.msra.gmra.mxu1 %vm604_vm8, %v1502_v32 }
 0x23b   : > { %v1724_v40 = vpop.f32.mrf.mxu0  ;;  %v1765_v43 = vpop.f32.mrf.mxu1 }
 0x23c   : > { %v1725_v42 = vadd.f32 %v1724_v40, %v1535_v37  ;;  %v1766_v45 = vadd.f32 %v1765_v43, %v1535_v37 }
 0x23d   : > { %v1726_v46 = vpop.f32.mrf.mxu0  ;;  %v1767_v49 = vpop.f32.mrf.mxu1 }
 0x23e   : > { %v1812_v22 = vmul.f32 %v1795_v39, %v1725_v42  ;;  %v1727_v48 = vadd.f32 %v1726_v46, %v1535_v37  ;;  %v1814_v50 = vmul.f32 %v1803_v41, %v1766_v45  ;;  %v1768_v51 = vadd.f32 %v1767_v49, %v1535_v37  ;;  %1818 = sbr.rel (%p2950_p8) target bundleno = 581 (0x245), region = 52 }
 0x23f   : > { %v1728_v52 = vpop.f32.mrf.mxu0  ;;  %v1769_v4 = vpop.f32.mrf.mxu1 }
 0x240   : > { %v2103_v53 = vpack.c.bf16 %v1727_v48, %v1725_v42  ;;  %v1813_v54 = vmul.f32 %v1799_v44, %v1727_v48  ;;  %v2104_v55 = vpack.c.bf16 %v1768_v51, %v1766_v45  ;;  %v1815_v56 = vmul.f32 %v1807_v47, %v1768_v51 }
 0x241   : > { %v1729_v57 = vpop.f32.mrf.mxu0  ;;  %v1770_v24 = vpop.f32.mrf.mxu1 }
 0x242   : > { %1788 = vst [vmem:[%s2631_s30] sm:$0xff] %v2103_v53  ;;  %1789 = vst [vmem:[%s2631_s30 + $0x8] sm:$0xff] %v2104_v55 }
 0x243   : > { %vm1819_vm0 = vcmask 7168   ;;  %v2447_v58 = vmov 0.0  }
 0x244   : > { %1820 = vst.msk [vmem:[%s2580_s8] sm:$0xff] %vm1819_vm0, %v2447_v58  ;;  %1821 = vst.msk [vmem:[%s2585_s26] sm:$0xff] %vm1819_vm0, %v2447_v58 }
 0x245 PF: > { %v1823_v25 = vadd.f32 %v1813_v54, %v1812_v22  ;;  %v1832_v59 = vmul.f32 %v1812_v22, %v1725_v42  ;;  %v1833_v5 = vmul.f32 %v1813_v54, %v1727_v48  ;;  %v1834_v60 = vmul.f32 %v1814_v50, %v1766_v45  ;;  %s2092_s24 = sshll.u32 %s2404_s25, 3  ;;  %s1868_s6 = sshll.u32 %s2631_s30, 4  ;;  %s1869_s6 = int_to_ptr.vmem [resolvable:$true] %s1868_s6 }
 0x246   : > { %v1835_v62 = vmul.f32 %v1815_v56, %v1768_v51  ;;  %s1864_s21 = sadd.s32 %s2092_s24, %s2557_s17  ;;  %s2952_s10 = sld [smem:[#allocation25_spill]] }
 0x247   : > { %v1824_v61 = vadd.f32 %v1823_v25, %v1814_v50  ;;  %v1836_v63 = vadd.f32 %v1833_v5, %v1832_v59  ;;  %s2093_s23 = sshll.u32 %s1864_s21, 6  ;;  %s2953_s5 = sand.u32 1, %s2392_s22  }
 0x248   : > { %s1844_s11 = scalar_lea.sflag [#allocation6], %s2953_s5  ;;  %s2322_s15 = scalar_lea.vmem %s1869_s6, 256 }
 0x249   : > { %v1825_v20 = vadd.f32 %v1824_v61, %v1815_v56  ;;  %v1837_v0 = vadd.f32 %v1836_v63, %v1834_v60  ;;  %p2323_p0 = scmp.ne.s32.totalorder %s1869_s6, %s2322_s15  ;;  %s2448_s18 = smov [#allocation5]  }
 0x24a   : > { %s2326_s27 = sshll.u32 %s2448_s18, 4  ;;  %s2327_s27 = int_to_ptr.vmem [resolvable:$false] %s2326_s27 }
 0x24b   : > { %1826 = vadd.xlane.f32.xlu0 %v1825_v20  ;;  %v1838_v1 = vadd.f32 %v1837_v0, %v1835_v62  ;;  %p2324_p7 = pnand %p2323_p0, %p2535_p3  ;;  %s2328_s16 = scalar_lea.vmem %s2327_s27, 512 }
 0x24c   : > { %s1866_s20 = scalar_lea.hbm %s2952_s10, %s2093_s23  ;;  %p2329_p11 = scmp.lt.s32.totalorder %s1869_s6, %s2327_s27 }
 0x24d   : > { %p2325_p10 = pneg %p2324_p7  ;;  %p2330_p12 = scmp.lt.s32.totalorder %s2328_s16, %s2322_s15 }
 0x24f   : > { %1839 = vadd.xlane.f32.xlu0 %v1838_v1  ;;  %p2331_p13 = por %p2330_p12, %p2329_p11 }
 0x251   : > { %p2332_p2 = pnand %p2331_p13, %p2325_p10 }
 0x253   : > { %2335 = shalt.err (!%p2332_p2)
}
 0x254   : > { %s2336_s25 = scalar_lea.hbm %s1866_s20, 256  ;;  %s2340_s7 = scalar_lea.hbm %s2952_s10, 1024 }
 0x255   : > { %p2337_p4 = scmp.ne.s32.totalorder %s1866_s20, %s2336_s25  ;;  %p2341_p1 = scmp.lt.s32.totalorder %s1866_s20, %s2952_s10 }
 0x256   : > { %p2342_p9 = scmp.lt.s32.totalorder %s2340_s7, %s2336_s25 }
 0x257   : > { %p2338_p6 = pnand %p2337_p4, %p2535_p3 }
 0x258   : > { %p2343_p8 = por %p2342_p9, %p2341_p1 }
 0x259   : > { %p2339_p5 = pneg %p2338_p6 }
 0x25b   : > { %p2344_p0 = pnand %p2343_p8, %p2339_p5 }
 0x25d   : > { %2347 = shalt.err (!%p2344_p0)
}
 0x25e   : > { %2109 = dma.vmem_to_hbm [thread:$0]  (%p2535_p3), %s1869_s6, 256, %s1866_s20, %s1844_s11   ;;  %v1822_v2 = vld [vmem:[%s2580_s8] sm:$0xff]  ;;  %vm1829_vm13 = vcmask 7168  }
 0x25f   : > { %v1831_v7 = vld [vmem:[%s2585_s26] sm:$0xff] }
 0x2d4   : > { %v1827_v3 = vpop.xlane.xlu0 %1826 }
 0x2d5   : > { %v1828_v6 = vadd.f32 %v1827_v3, %v1822_v2 }
 0x2d7   : > { %1830 = vst.msk [vmem:[%s2580_s8] sm:$0xff] %vm1829_vm13, %v1828_v6 }
 0x2d8   : > { %v1840_v8 = vpop.xlane.xlu0 %1839 }
 0x2d9   : > { %v1841_v9 = vadd.f32 %v1840_v8, %v1831_v7 }
 0x2db   : > { %1842 = vst.msk [vmem:[%s2585_s26] sm:$0xff] %vm1829_vm13, %v1841_v9 }
 0x2dc PF: > { %s2954_s14 = sld [smem:[#allocation19_spill]] }
 0x2dd   : > { %s2955_s9 = sld [smem:[#allocation15_spill]] }
 0x2de   : > { %s2956_s29 = sld [smem:[#allocation23_spill]] }
 0x2e2   : > { %p2117_p7 = scmp.ge.s32.totalorder %s2954_s14, 2 }
 0x2e3   : > { %s1886_s19 = sand.u32 1, %s2955_s9  }
 0x2e4   : > { %p2957_p10 = scmp.ne.s32.totalorder %s2956_s29, 0  ;;  %s1887_s24 = scalar_lea.sflag [#allocation6], %s1886_s19 }
 0x2e6   : > { %p2112_p11 = pnand %p2117_p7, %p2957_p10 }
 0x2e8   : > { %p2113_p12 = pneg %p2112_p11 }
 0x2ea   : > { %2383 = dma.done.wait (%p2113_p12), %s1887_s24, 256  }
 0x2eb   : > { %2385 = vsyncadd (%p2113_p12), %s1887_s24, 4294967040  ;;  %s20_s28 = sadd.s32 1, %s2954_s14   ;;  %s2958_s8 = sld [smem:[#allocation16_spill]] }
 0x2ec   : > { %p17_p3 = scmp.ge.s32.totalorder %s20_s28, 6   ;;  %s2959_s23 = sld [smem:[#allocation24_spill]] }
 0x2ed   : > { %s2960_s24 = sld [smem:[#allocation17_spill]]  ;;  %s2964_s21 = smov %s2392_s22 }
 0x2ee   : > { %s2961_s25 = sld [smem:[#allocation18_spill]]  ;;  %19 = sbr.rel (!%p17_p3) target bundleno = 9 (0x9), region = 120 }
 0x2ef   : > { %s2962_s26 = sld [smem:[#allocation20_spill]] }
 0x2f0   : > { %s2963_s27 = sld [smem:[#allocation22_spill]] }
 0x2f1   : > { %s2965_s22 = smov %s2958_s8 }
 0x2f3   :  { %1906 = vsyncpa [#allocation6], 1 }
 0x2f4   :  { %1908 = vsyncpa [#allocation6 + $0x1], 1 }
 0x2f5   :  { %1909 = vsyncmov [#allocation4] }
 0x2f8   :  { %s1910_s6 = vpop.sfrf %1909 }
 0x2f9   :  { %p2096_p13 = scmp.ne.s32.totalorder %s1910_s6, 0 }
 0x2fb   :  { %1914 = shalt.err (%p2096_p13)  }
 0x2fc   :  { %1916 = vsyncmov [#allocation4 + $0x1] }
 0x2ff   :  { %s1917_s4 = vpop.sfrf %1916 }
 0x300   :  { %p2097_p2 = scmp.ne.s32.totalorder %s1917_s4, 0 }
 0x302   :  { %1921 = shalt.err (%p2097_p2)  }

</bundles_post_ra>
